<compile_context>
chip_gen: v6e
topology: v6e:2x2x1
jax: 0.10.0
libtpu: 0.0.40
codegen_flags: <defaults>
</compile_context>

<pallas_src>
import functools

import jax
import jax.numpy as jnp
import numpy as np
from jax import lax
from jax.experimental import pallas as pl
from jax.experimental.pallas import tpu as pltpu


def _matching_kernel(anc1_ref, anc2_ref,        # SMEM scalar prefetch: (P_pad,) int32 each
                     emb1_hbm, emb2_hbm,        # HBM refs: (N1, Dp), (N2, Dp) f32
                     w1_ref, b1_ref,            # VMEM: (Dp, Dp), (1, Dp) f32
                     out_ref,                   # VMEM: (1, 1) f32
                     x1_buf, x2_buf,            # VMEM scratch: (2, BP, Dp) f32
                     sem,                       # DMA sems: (2, 2, BP)
                     acc_ref,                   # VMEM scratch: (1, 1) f32
                     *, block_p, p_true):
    i = pl.program_id(0)
    nsteps = pl.num_programs(0)

    def issue_gather(block_idx, slot):
        base = block_idx * block_p
        for j in range(block_p):
            r1 = anc1_ref[base + j]
            r2 = anc2_ref[base + j]
            pltpu.make_async_copy(emb1_hbm.at[pl.ds(r1, 1), :],
                                  x1_buf.at[slot, pl.ds(j, 1), :],
                                  sem.at[0, slot, j]).start()
            pltpu.make_async_copy(emb2_hbm.at[pl.ds(r2, 1), :],
                                  x2_buf.at[slot, pl.ds(j, 1), :],
                                  sem.at[1, slot, j]).start()

    def wait_gather(slot):
        # Wait only needs the destination/semaphore (transfer sizes match).
        for j in range(block_p):
            pltpu.make_async_copy(emb1_hbm.at[pl.ds(0, 1), :],
                                  x1_buf.at[slot, pl.ds(j, 1), :],
                                  sem.at[0, slot, j]).wait()
            pltpu.make_async_copy(emb2_hbm.at[pl.ds(0, 1), :],
                                  x2_buf.at[slot, pl.ds(j, 1), :],
                                  sem.at[1, slot, j]).wait()

    @pl.when(i == 0)
    def _():
        acc_ref[...] = jnp.zeros_like(acc_ref)
        issue_gather(0, 0)

    slot = i & 1

    # Prefetch next anchor block while computing the current one.
    @pl.when(i + 1 < nsteps)
    def _():
        issue_gather(i + 1, 1 - slot)

    wait_gather(slot)

    x1 = x1_buf[slot]                                        # (BP, Dp)
    x2 = x2_buf[slot]                                        # (BP, Dp)

    # fc1 applied only to the gathered anchor rows of embedding_2.
    x2a = jnp.dot(x2, w1_ref[...],
                  preferred_element_type=jnp.float32) + b1_ref[...]

    dots = jnp.sum(x1 * x2a, axis=1, keepdims=True)          # (BP, 1)
    # -logsigmoid(d) = softplus(-d), numerically stable form.
    per = jnp.maximum(-dots, 0.0) + jnp.log1p(jnp.exp(-jnp.abs(dots)))

    # Mask out padded anchor rows (global index >= true P).
    row = i * block_p + lax.broadcasted_iota(jnp.int32, (block_p, 1), 0)
    valid = (row < p_true).astype(jnp.float32)
    acc_ref[...] += jnp.sum(per * valid, keepdims=True)

    @pl.when(i == nsteps - 1)
    def _():
        out_ref[...] = acc_ref[...] * jnp.float32(1.0 / p_true)


def matching_forward(embedding_1, embedding_2, anchors, w1, b1, *, block_p=8):
    """embedding_1: (N1, D) f32, embedding_2: (N2, D) f32, anchors: (P, 2) int32,
    w1: (D, D) f32 pre-transposed nn.Linear weight (d_in, d_out), b1: (1, D) f32."""
    _, d = embedding_1.shape
    p = anchors.shape[0]

    d_pad = pl.cdiv(d, 128) * 128
    p_pad = pl.cdiv(p, block_p) * block_p
    num_blocks = p_pad // block_p

    def pad_cols(x, cols):
        return x if x.shape[1] == cols else jnp.pad(x, ((0, 0), (0, cols - x.shape[1])))

    e1 = pad_cols(embedding_1.astype(jnp.float32), d_pad)
    e2 = pad_cols(embedding_2.astype(jnp.float32), d_pad)
    w1p = jnp.pad(w1.astype(jnp.float32), ((0, d_pad - d), (0, d_pad - d)))
    b1p = pad_cols(b1.reshape(1, -1).astype(jnp.float32), d_pad)

    # Padded anchors point at row 0 (valid) and are masked out of the mean.
    anc1 = jnp.pad(anchors[:, 0].astype(jnp.int32), (0, p_pad - p))
    anc2 = jnp.pad(anchors[:, 1].astype(jnp.int32), (0, p_pad - p))

    kernel = functools.partial(_matching_kernel, block_p=block_p, p_true=p)

    grid_spec = pltpu.PrefetchScalarGridSpec(
        num_scalar_prefetch=2,
        grid=(num_blocks,),
        in_specs=[
            pl.BlockSpec(memory_space=pl.ANY),                        # embedding_1 stays in HBM
            pl.BlockSpec(memory_space=pl.ANY),                        # embedding_2 stays in HBM
            pl.BlockSpec((d_pad, d_pad), lambda i, a1, a2: (0, 0)),   # fc1 weight (resident)
            pl.BlockSpec((1, d_pad), lambda i, a1, a2: (0, 0)),       # fc1 bias (resident)
        ],
        out_specs=pl.BlockSpec((1, 1), lambda i, a1, a2: (0, 0)),
        scratch_shapes=[
            pltpu.VMEM((2, block_p, d_pad), jnp.float32),             # x1 double buffer
            pltpu.VMEM((2, block_p, d_pad), jnp.float32),             # x2 double buffer
            pltpu.SemaphoreType.DMA((2, 2, block_p)),
            pltpu.VMEM((1, 1), jnp.float32),                          # loss accumulator
        ],
    )

    out = pl.pallas_call(
        kernel,
        out_shape=jax.ShapeDtypeStruct((1, 1), jnp.float32),
        grid_spec=grid_spec,
        compiler_params=pltpu.CompilerParams(
            dimension_semantics=("arbitrary",)),
    )(anc1, anc2, e1, e2, w1p, b1p)
    return out[0, 0]


def _reference(embedding_1, embedding_2, anchors, w1, b1):
    emb2_after = embedding_2 @ w1 + b1.reshape(1, -1)
    x1 = embedding_1[anchors[:, 0]]
    x2 = emb2_after[anchors[:, 1]]
    dots = jnp.sum(x1 * x2, axis=1)
    return jnp.mean(jax.nn.softplus(-dots))


if __name__ == "__main__":
    key = jax.random.PRNGKey(0)
    k1, k2, k3, k4, k5 = jax.random.split(key, 5)

    N1, N2, D, P = 16, 16, 32, 8

    embedding_1 = jax.random.normal(k1, (N1, D), dtype=jnp.float32)
    embedding_2 = jax.random.normal(k2, (N2, D), dtype=jnp.float32)

    # nn.Linear(d, d) parameters (deterministic uniform init, pre-transposed).
    bound = 1.0 / np.sqrt(D)
    w1 = jax.random.uniform(k3, (D, D), minval=-bound, maxval=bound,
                            dtype=jnp.float32)            # (d_in, d_out)
    b1 = jax.random.uniform(k4, (1, D), minval=-bound, maxval=bound,
                            dtype=jnp.float32)
    # fc2 is defined in __init__ but unused in forward(); initialized only.
    _w2 = jax.random.uniform(k5, (D, D), minval=-bound, maxval=bound,
                             dtype=jnp.float32)

    anchors = jnp.stack(
        [jax.random.randint(jax.random.PRNGKey(1), (P,), 0, N1),
         jax.random.randint(jax.random.PRNGKey(2), (P,), 0, N2)],
        axis=1).astype(jnp.int32)                          # (P, 2)

    loss = matching_forward(embedding_1, embedding_2, anchors, w1, b1)
    jax.block_until_ready(loss)

    ref = _reference(embedding_1, embedding_2, anchors, w1, b1)
    np.testing.assert_allclose(np.asarray(loss), np.asarray(ref),
                               rtol=1e-5, atol=1e-5)

    print("KERNEL_OK")
</pallas_src>

<mosaic_0001>
module attributes {stable_mosaic.version = 11 : i64} {
  func.func @_matching_kernel(%arg0: i32, %arg1: memref<8xi32, #tpu.memory_space<smem>>, %arg2: memref<8xi32, #tpu.memory_space<smem>>, %arg3: memref<16x128xf32, #tpu.memory_space<any>>, %arg4: memref<16x128xf32, #tpu.memory_space<any>>, %arg5: memref<128x128xf32, #tpu.memory_space<vmem>>, %arg6: memref<1x128xf32, #tpu.memory_space<vmem>>, %arg7: memref<1x1xf32, #tpu.memory_space<vmem>>, %arg8: memref<2x8x128xf32, #tpu.memory_space<vmem>>, %arg9: memref<2x8x128xf32, #tpu.memory_space<vmem>>, %arg10: memref<2x2x8x!tpu.dma_semaphore, #tpu.memory_space<semaphore_mem>>, %arg11: memref<1x1xf32, #tpu.memory_space<vmem>>) attributes {dimension_semantics = [#tpu.dimension_semantics<arbitrary>], iteration_bounds = array<i64: 1>, scalar_prefetch = 2 : i64, scratch_operands = 4 : i64, tpu.core_type = #tpu.core_type<tc>, window_params = [{}, {}, {pipeline_mode = #tpu.pipeline_mode<synchronous>, transform_indices = @transform_2, window_bounds = array<i64: 128, 128>}, {pipeline_mode = #tpu.pipeline_mode<synchronous>, transform_indices = @transform_3, window_bounds = array<i64: 1, 128>}, {pipeline_mode = #tpu.pipeline_mode<synchronous>, transform_indices = @transform_4, window_bounds = array<i64: 1, 1>}]} {
    %c0_i32 = arith.constant 0 : i32
    %0 = arith.cmpi eq, %arg0, %c0_i32 : i32
    %1 = arith.extui %0 : i1 to i32
    %c0_i32_0 = arith.constant 0 : i32
    %2 = arith.cmpi ne, %1, %c0_i32_0 : i32
    scf.if %2 {
      %cst_113 = arith.constant 0.000000e+00 : f32
      %132 = vector.broadcast %cst_113 : f32 to vector<1x1xf32>
      %c0_114 = arith.constant 0 : index
      %c0_115 = arith.constant 0 : index
      %133 = vector.load %arg11[%c0_114, %c0_115] : memref<1x1xf32, #tpu.memory_space<vmem>>, vector<1x1xf32>
      tpu.vector_store %arg11[%c0_114, %c0_115], %132 {strides = array<i32>} : memref<1x1xf32, #tpu.memory_space<vmem>>, vector<1x1xf32>,
      %c0_116 = arith.constant 0 : index
      %134 = memref.load %arg1[%c0_116] : memref<8xi32, #tpu.memory_space<smem>>
      %c0_117 = arith.constant 0 : index
      %135 = memref.load %arg2[%c0_117] : memref<8xi32, #tpu.memory_space<smem>>
      %c0_i32_118 = arith.constant 0 : i32
      %c0_i32_119 = arith.constant 0 : i32
      %c0_i32_120 = arith.constant 0 : i32
      %c0_i32_121 = arith.constant 0 : i32
      %c0_i32_122 = arith.constant 0 : i32
      %136 = tpu.memref_slice %arg3[%134, %c0_i32_122] : memref<16x128xf32, #tpu.memory_space<any>> -> memref<1x128xf32, #tpu.memory_space<any>>
      %c0_i32_123 = arith.constant 0 : i32
      %c0_i32_124 = arith.constant 0 : i32
      %137 = tpu.memref_slice %arg8[%c0_i32_118, %c0_i32_123, %c0_i32_124] : memref<2x8x128xf32, #tpu.memory_space<vmem>> -> memref<1x1x128xf32, #tpu.memory_space<vmem>>
      %138 = tpu.memref_squeeze %137 : memref<1x1x128xf32, #tpu.memory_space<vmem>> -> memref<1x128xf32, #tpu.memory_space<vmem>>
      %139 = tpu.memref_slice %arg10[%c0_i32_119, %c0_i32_120, %c0_i32_121] : memref<2x2x8x!tpu.dma_semaphore, #tpu.memory_space<semaphore_mem>> -> memref<1x1x1x!tpu.dma_semaphore, #tpu.memory_space<semaphore_mem>>
      %140 = tpu.memref_squeeze %139 : memref<1x1x1x!tpu.dma_semaphore, #tpu.memory_space<semaphore_mem>> -> memref<!tpu.dma_semaphore, #tpu.memory_space<semaphore_mem>>
      tpu.enqueue_dma source(%136 : memref<1x128xf32, #tpu.memory_space<any>>) target(%138 : memref<1x128xf32, #tpu.memory_space<vmem>>) target_semaphore(%140 : memref<!tpu.dma_semaphore, #tpu.memory_space<semaphore_mem>>)
      %c0_i32_125 = arith.constant 0 : i32
      %c1_i32_126 = arith.constant 1 : i32
      %c0_i32_127 = arith.constant 0 : i32
      %c0_i32_128 = arith.constant 0 : i32
      %c0_i32_129 = arith.constant 0 : i32
      %141 = tpu.memref_slice %arg4[%135, %c0_i32_129] : memref<16x128xf32, #tpu.memory_space<any>> -> memref<1x128xf32, #tpu.memory_space<any>>
      %c0_i32_130 = arith.constant 0 : i32
      %c0_i32_131 = arith.constant 0 : i32
      %142 = tpu.memref_slice %arg9[%c0_i32_125, %c0_i32_130, %c0_i32_131] : memref<2x8x128xf32, #tpu.memory_space<vmem>> -> memref<1x1x128xf32, #tpu.memory_space<vmem>>
      %143 = tpu.memref_squeeze %142 : memref<1x1x128xf32, #tpu.memory_space<vmem>> -> memref<1x128xf32, #tpu.memory_space<vmem>>
      %144 = tpu.memref_slice %arg10[%c1_i32_126, %c0_i32_127, %c0_i32_128] : memref<2x2x8x!tpu.dma_semaphore, #tpu.memory_space<semaphore_mem>> -> memref<1x1x1x!tpu.dma_semaphore, #tpu.memory_space<semaphore_mem>>
      %145 = tpu.memref_squeeze %144 : memref<1x1x1x!tpu.dma_semaphore, #tpu.memory_space<semaphore_mem>> -> memref<!tpu.dma_semaphore, #tpu.memory_space<semaphore_mem>>
      tpu.enqueue_dma source(%141 : memref<1x128xf32, #tpu.memory_space<any>>) target(%143 : memref<1x128xf32, #tpu.memory_space<vmem>>) target_semaphore(%145 : memref<!tpu.dma_semaphore, #tpu.memory_space<semaphore_mem>>)
      %c1 = arith.constant 1 : index
      %146 = memref.load %arg1[%c1] : memref<8xi32, #tpu.memory_space<smem>>
      %c1_132 = arith.constant 1 : index
      %147 = memref.load %arg2[%c1_132] : memref<8xi32, #tpu.memory_space<smem>>
      %c0_i32_133 = arith.constant 0 : i32
      %c0_i32_134 = arith.constant 0 : i32
      %c0_i32_135 = arith.constant 0 : i32
      %c1_i32_136 = arith.constant 1 : i32
      %c0_i32_137 = arith.constant 0 : i32
      %148 = tpu.memref_slice %arg3[%146, %c0_i32_137] : memref<16x128xf32, #tpu.memory_space<any>> -> memref<1x128xf32, #tpu.memory_space<any>>
      %c1_i32_138 = arith.constant 1 : i32
      %c0_i32_139 = arith.constant 0 : i32
      %149 = tpu.memref_slice %arg8[%c0_i32_133, %c1_i32_138, %c0_i32_139] : memref<2x8x128xf32, #tpu.memory_space<vmem>> -> memref<1x1x128xf32, #tpu.memory_space<vmem>>
      %150 = tpu.memref_squeeze %149 : memref<1x1x128xf32, #tpu.memory_space<vmem>> -> memref<1x128xf32, #tpu.memory_space<vmem>>
      %151 = tpu.memref_slice %arg10[%c0_i32_134, %c0_i32_135, %c1_i32_136] : memref<2x2x8x!tpu.dma_semaphore, #tpu.memory_space<semaphore_mem>> -> memref<1x1x1x!tpu.dma_semaphore, #tpu.memory_space<semaphore_mem>>
      %152 = tpu.memref_squeeze %151 : memref<1x1x1x!tpu.dma_semaphore, #tpu.memory_space<semaphore_mem>> -> memref<!tpu.dma_semaphore, #tpu.memory_space<semaphore_mem>>
      tpu.enqueue_dma source(%148 : memref<1x128xf32, #tpu.memory_space<any>>) target(%150 : memref<1x128xf32, #tpu.memory_space<vmem>>) target_semaphore(%152 : memref<!tpu.dma_semaphore, #tpu.memory_space<semaphore_mem>>)
      %c0_i32_140 = arith.constant 0 : i32
      %c1_i32_141 = arith.constant 1 : i32
      %c0_i32_142 = arith.constant 0 : i32
      %c1_i32_143 = arith.constant 1 : i32
      %c0_i32_144 = arith.constant 0 : i32
      %153 = tpu.memref_slice %arg4[%147, %c0_i32_144] : memref<16x128xf32, #tpu.memory_space<any>> -> memref<1x128xf32, #tpu.memory_space<any>>
      %c1_i32_145 = arith.constant 1 : i32
      %c0_i32_146 = arith.constant 0 : i32
      %154 = tpu.memref_slice %arg9[%c0_i32_140, %c1_i32_145, %c0_i32_146] : memref<2x8x128xf32, #tpu.memory_space<vmem>> -> memref<1x1x128xf32, #tpu.memory_space<vmem>>
      %155 = tpu.memref_squeeze %154 : memref<1x1x128xf32, #tpu.memory_space<vmem>> -> memref<1x128xf32, #tpu.memory_space<vmem>>
      %156 = tpu.memref_slice %arg10[%c1_i32_141, %c0_i32_142, %c1_i32_143] : memref<2x2x8x!tpu.dma_semaphore, #tpu.memory_space<semaphore_mem>> -> memref<1x1x1x!tpu.dma_semaphore, #tpu.memory_space<semaphore_mem>>
      %157 = tpu.memref_squeeze %156 : memref<1x1x1x!tpu.dma_semaphore, #tpu.memory_space<semaphore_mem>> -> memref<!tpu.dma_semaphore, #tpu.memory_space<semaphore_mem>>
      tpu.enqueue_dma source(%153 : memref<1x128xf32, #tpu.memory_space<any>>) target(%155 : memref<1x128xf32, #tpu.memory_space<vmem>>) target_semaphore(%157 : memref<!tpu.dma_semaphore, #tpu.memory_space<semaphore_mem>>)
      %c2 = arith.constant 2 : index
      %158 = memref.load %arg1[%c2] : memref<8xi32, #tpu.memory_space<smem>>
      %c2_147 = arith.constant 2 : index
      %159 = memref.load %arg2[%c2_147] : memref<8xi32, #tpu.memory_space<smem>>
      %c0_i32_148 = arith.constant 0 : i32
      %c0_i32_149 = arith.constant 0 : i32
      %c0_i32_150 = arith.constant 0 : i32
      %c2_i32_151 = arith.constant 2 : i32
      %c0_i32_152 = arith.constant 0 : i32
      %160 = tpu.memref_slice %arg3[%158, %c0_i32_152] : memref<16x128xf32, #tpu.memory_space<any>> -> memref<1x128xf32, #tpu.memory_space<any>>
      %c2_i32_153 = arith.constant 2 : i32
      %c0_i32_154 = arith.constant 0 : i32
      %161 = tpu.memref_slice %arg8[%c0_i32_148, %c2_i32_153, %c0_i32_154] : memref<2x8x128xf32, #tpu.memory_space<vmem>> -> memref<1x1x128xf32, #tpu.memory_space<vmem>>
      %162 = tpu.memref_squeeze %161 : memref<1x1x128xf32, #tpu.memory_space<vmem>> -> memref<1x128xf32, #tpu.memory_space<vmem>>
      %163 = tpu.memref_slice %arg10[%c0_i32_149, %c0_i32_150, %c2_i32_151] : memref<2x2x8x!tpu.dma_semaphore, #tpu.memory_space<semaphore_mem>> -> memref<1x1x1x!tpu.dma_semaphore, #tpu.memory_space<semaphore_mem>>
      %164 = tpu.memref_squeeze %163 : memref<1x1x1x!tpu.dma_semaphore, #tpu.memory_space<semaphore_mem>> -> memref<!tpu.dma_semaphore, #tpu.memory_space<semaphore_mem>>
      tpu.enqueue_dma source(%160 : memref<1x128xf32, #tpu.memory_space<any>>) target(%162 : memref<1x128xf32, #tpu.memory_space<vmem>>) target_semaphore(%164 : memref<!tpu.dma_semaphore, #tpu.memory_space<semaphore_mem>>)
      %c0_i32_155 = arith.constant 0 : i32
      %c1_i32_156 = arith.constant 1 : i32
      %c0_i32_157 = arith.constant 0 : i32
      %c2_i32_158 = arith.constant 2 : i32
      %c0_i32_159 = arith.constant 0 : i32
      %165 = tpu.memref_slice %arg4[%159, %c0_i32_159] : memref<16x128xf32, #tpu.memory_space<any>> -> memref<1x128xf32, #tpu.memory_space<any>>
      %c2_i32_160 = arith.constant 2 : i32
      %c0_i32_161 = arith.constant 0 : i32
      %166 = tpu.memref_slice %arg9[%c0_i32_155, %c2_i32_160, %c0_i32_161] : memref<2x8x128xf32, #tpu.memory_space<vmem>> -> memref<1x1x128xf32, #tpu.memory_space<vmem>>
      %167 = tpu.memref_squeeze %166 : memref<1x1x128xf32, #tpu.memory_space<vmem>> -> memref<1x128xf32, #tpu.memory_space<vmem>>
      %168 = tpu.memref_slice %arg10[%c1_i32_156, %c0_i32_157, %c2_i32_158] : memref<2x2x8x!tpu.dma_semaphore, #tpu.memory_space<semaphore_mem>> -> memref<1x1x1x!tpu.dma_semaphore, #tpu.memory_space<semaphore_mem>>
      %169 = tpu.memref_squeeze %168 : memref<1x1x1x!tpu.dma_semaphore, #tpu.memory_space<semaphore_mem>> -> memref<!tpu.dma_semaphore, #tpu.memory_space<semaphore_mem>>
      tpu.enqueue_dma source(%165 : memref<1x128xf32, #tpu.memory_space<any>>) target(%167 : memref<1x128xf32, #tpu.memory_space<vmem>>) target_semaphore(%169 : memref<!tpu.dma_semaphore, #tpu.memory_space<semaphore_mem>>)
      %c3 = arith.constant 3 : index
      %170 = memref.load %arg1[%c3] : memref<8xi32, #tpu.memory_space<smem>>
      %c3_162 = arith.constant 3 : index
      %171 = memref.load %arg2[%c3_162] : memref<8xi32, #tpu.memory_space<smem>>
      %c0_i32_163 = arith.constant 0 : i32
      %c0_i32_164 = arith.constant 0 : i32
      %c0_i32_165 = arith.constant 0 : i32
      %c3_i32_166 = arith.constant 3 : i32
      %c0_i32_167 = arith.constant 0 : i32
      %172 = tpu.memref_slice %arg3[%170, %c0_i32_167] : memref<16x128xf32, #tpu.memory_space<any>> -> memref<1x128xf32, #tpu.memory_space<any>>
      %c3_i32_168 = arith.constant 3 : i32
      %c0_i32_169 = arith.constant 0 : i32
      %173 = tpu.memref_slice %arg8[%c0_i32_163, %c3_i32_168, %c0_i32_169] : memref<2x8x128xf32, #tpu.memory_space<vmem>> -> memref<1x1x128xf32, #tpu.memory_space<vmem>>
      %174 = tpu.memref_squeeze %173 : memref<1x1x128xf32, #tpu.memory_space<vmem>> -> memref<1x128xf32, #tpu.memory_space<vmem>>
      %175 = tpu.memref_slice %arg10[%c0_i32_164, %c0_i32_165, %c3_i32_166] : memref<2x2x8x!tpu.dma_semaphore, #tpu.memory_space<semaphore_mem>> -> memref<1x1x1x!tpu.dma_semaphore, #tpu.memory_space<semaphore_mem>>
      %176 = tpu.memref_squeeze %175 : memref<1x1x1x!tpu.dma_semaphore, #tpu.memory_space<semaphore_mem>> -> memref<!tpu.dma_semaphore, #tpu.memory_space<semaphore_mem>>
      tpu.enqueue_dma source(%172 : memref<1x128xf32, #tpu.memory_space<any>>) target(%174 : memref<1x128xf32, #tpu.memory_space<vmem>>) target_semaphore(%176 : memref<!tpu.dma_semaphore, #tpu.memory_space<semaphore_mem>>)
      %c0_i32_170 = arith.constant 0 : i32
      %c1_i32_171 = arith.constant 1 : i32
      %c0_i32_172 = arith.constant 0 : i32
      %c3_i32_173 = arith.constant 3 : i32
      %c0_i32_174 = arith.constant 0 : i32
      %177 = tpu.memref_slice %arg4[%171, %c0_i32_174] : memref<16x128xf32, #tpu.memory_space<any>> -> memref<1x128xf32, #tpu.memory_space<any>>
      %c3_i32_175 = arith.constant 3 : i32
      %c0_i32_176 = arith.constant 0 : i32
      %178 = tpu.memref_slice %arg9[%c0_i32_170, %c3_i32_175, %c0_i32_176] : memref<2x8x128xf32, #tpu.memory_space<vmem>> -> memref<1x1x128xf32, #tpu.memory_space<vmem>>
      %179 = tpu.memref_squeeze %178 : memref<1x1x128xf32, #tpu.memory_space<vmem>> -> memref<1x128xf32, #tpu.memory_space<vmem>>
      %180 = tpu.memref_slice %arg10[%c1_i32_171, %c0_i32_172, %c3_i32_173] : memref<2x2x8x!tpu.dma_semaphore, #tpu.memory_space<semaphore_mem>> -> memref<1x1x1x!tpu.dma_semaphore, #tpu.memory_space<semaphore_mem>>
      %181 = tpu.memref_squeeze %180 : memref<1x1x1x!tpu.dma_semaphore, #tpu.memory_space<semaphore_mem>> -> memref<!tpu.dma_semaphore, #tpu.memory_space<semaphore_mem>>
      tpu.enqueue_dma source(%177 : memref<1x128xf32, #tpu.memory_space<any>>) target(%179 : memref<1x128xf32, #tpu.memory_space<vmem>>) target_semaphore(%181 : memref<!tpu.dma_semaphore, #tpu.memory_space<semaphore_mem>>)
      %c4 = arith.constant 4 : index
      %182 = memref.load %arg1[%c4] : memref<8xi32, #tpu.memory_space<smem>>
      %c4_177 = arith.constant 4 : index
      %183 = memref.load %arg2[%c4_177] : memref<8xi32, #tpu.memory_space<smem>>
      %c0_i32_178 = arith.constant 0 : i32
      %c0_i32_179 = arith.constant 0 : i32
      %c0_i32_180 = arith.constant 0 : i32
      %c4_i32_181 = arith.constant 4 : i32
      %c0_i32_182 = arith.constant 0 : i32
      %184 = tpu.memref_slice %arg3[%182, %c0_i32_182] : memref<16x128xf32, #tpu.memory_space<any>> -> memref<1x128xf32, #tpu.memory_space<any>>
      %c4_i32_183 = arith.constant 4 : i32
      %c0_i32_184 = arith.constant 0 : i32
      %185 = tpu.memref_slice %arg8[%c0_i32_178, %c4_i32_183, %c0_i32_184] : memref<2x8x128xf32, #tpu.memory_space<vmem>> -> memref<1x1x128xf32, #tpu.memory_space<vmem>>
      %186 = tpu.memref_squeeze %185 : memref<1x1x128xf32, #tpu.memory_space<vmem>> -> memref<1x128xf32, #tpu.memory_space<vmem>>
      %187 = tpu.memref_slice %arg10[%c0_i32_179, %c0_i32_180, %c4_i32_181] : memref<2x2x8x!tpu.dma_semaphore, #tpu.memory_space<semaphore_mem>> -> memref<1x1x1x!tpu.dma_semaphore, #tpu.memory_space<semaphore_mem>>
      %188 = tpu.memref_squeeze %187 : memref<1x1x1x!tpu.dma_semaphore, #tpu.memory_space<semaphore_mem>> -> memref<!tpu.dma_semaphore, #tpu.memory_space<semaphore_mem>>
      tpu.enqueue_dma source(%184 : memref<1x128xf32, #tpu.memory_space<any>>) target(%186 : memref<1x128xf32, #tpu.memory_space<vmem>>) target_semaphore(%188 : memref<!tpu.dma_semaphore, #tpu.memory_space<semaphore_mem>>)
      %c0_i32_185 = arith.constant 0 : i32
      %c1_i32_186 = arith.constant 1 : i32
      %c0_i32_187 = arith.constant 0 : i32
      %c4_i32_188 = arith.constant 4 : i32
      %c0_i32_189 = arith.constant 0 : i32
      %189 = tpu.memref_slice %arg4[%183, %c0_i32_189] : memref<16x128xf32, #tpu.memory_space<any>> -> memref<1x128xf32, #tpu.memory_space<any>>
      %c4_i32_190 = arith.constant 4 : i32
      %c0_i32_191 = arith.constant 0 : i32
      %190 = tpu.memref_slice %arg9[%c0_i32_185, %c4_i32_190, %c0_i32_191] : memref<2x8x128xf32, #tpu.memory_space<vmem>> -> memref<1x1x128xf32, #tpu.memory_space<vmem>>
      %191 = tpu.memref_squeeze %190 : memref<1x1x128xf32, #tpu.memory_space<vmem>> -> memref<1x128xf32, #tpu.memory_space<vmem>>
      %192 = tpu.memref_slice %arg10[%c1_i32_186, %c0_i32_187, %c4_i32_188] : memref<2x2x8x!tpu.dma_semaphore, #tpu.memory_space<semaphore_mem>> -> memref<1x1x1x!tpu.dma_semaphore, #tpu.memory_space<semaphore_mem>>
      %193 = tpu.memref_squeeze %192 : memref<1x1x1x!tpu.dma_semaphore, #tpu.memory_space<semaphore_mem>> -> memref<!tpu.dma_semaphore, #tpu.memory_space<semaphore_mem>>
      tpu.enqueue_dma source(%189 : memref<1x128xf32, #tpu.memory_space<any>>) target(%191 : memref<1x128xf32, #tpu.memory_space<vmem>>) target_semaphore(%193 : memref<!tpu.dma_semaphore, #tpu.memory_space<semaphore_mem>>)
      %c5 = arith.constant 5 : index
      %194 = memref.load %arg1[%c5] : memref<8xi32, #tpu.memory_space<smem>>
      %c5_192 = arith.constant 5 : index
      %195 = memref.load %arg2[%c5_192] : memref<8xi32, #tpu.memory_space<smem>>
      %c0_i32_193 = arith.constant 0 : i32
      %c0_i32_194 = arith.constant 0 : i32
      %c0_i32_195 = arith.constant 0 : i32
      %c5_i32_196 = arith.constant 5 : i32
      %c0_i32_197 = arith.constant 0 : i32
      %196 = tpu.memref_slice %arg3[%194, %c0_i32_197] : memref<16x128xf32, #tpu.memory_space<any>> -> memref<1x128xf32, #tpu.memory_space<any>>
      %c5_i32_198 = arith.constant 5 : i32
      %c0_i32_199 = arith.constant 0 : i32
      %197 = tpu.memref_slice %arg8[%c0_i32_193, %c5_i32_198, %c0_i32_199] : memref<2x8x128xf32, #tpu.memory_space<vmem>> -> memref<1x1x128xf32, #tpu.memory_space<vmem>>
      %198 = tpu.memref_squeeze %197 : memref<1x1x128xf32, #tpu.memory_space<vmem>> -> memref<1x128xf32, #tpu.memory_space<vmem>>
      %199 = tpu.memref_slice %arg10[%c0_i32_194, %c0_i32_195, %c5_i32_196] : memref<2x2x8x!tpu.dma_semaphore, #tpu.memory_space<semaphore_mem>> -> memref<1x1x1x!tpu.dma_semaphore, #tpu.memory_space<semaphore_mem>>
      %200 = tpu.memref_squeeze %199 : memref<1x1x1x!tpu.dma_semaphore, #tpu.memory_space<semaphore_mem>> -> memref<!tpu.dma_semaphore, #tpu.memory_space<semaphore_mem>>
      tpu.enqueue_dma source(%196 : memref<1x128xf32, #tpu.memory_space<any>>) target(%198 : memref<1x128xf32, #tpu.memory_space<vmem>>) target_semaphore(%200 : memref<!tpu.dma_semaphore, #tpu.memory_space<semaphore_mem>>)
      %c0_i32_200 = arith.constant 0 : i32
      %c1_i32_201 = arith.constant 1 : i32
      %c0_i32_202 = arith.constant 0 : i32
      %c5_i32_203 = arith.constant 5 : i32
      %c0_i32_204 = arith.constant 0 : i32
      %201 = tpu.memref_slice %arg4[%195, %c0_i32_204] : memref<16x128xf32, #tpu.memory_space<any>> -> memref<1x128xf32, #tpu.memory_space<any>>
      %c5_i32_205 = arith.constant 5 : i32
      %c0_i32_206 = arith.constant 0 : i32
      %202 = tpu.memref_slice %arg9[%c0_i32_200, %c5_i32_205, %c0_i32_206] : memref<2x8x128xf32, #tpu.memory_space<vmem>> -> memref<1x1x128xf32, #tpu.memory_space<vmem>>
      %203 = tpu.memref_squeeze %202 : memref<1x1x128xf32, #tpu.memory_space<vmem>> -> memref<1x128xf32, #tpu.memory_space<vmem>>
      %204 = tpu.memref_slice %arg10[%c1_i32_201, %c0_i32_202, %c5_i32_203] : memref<2x2x8x!tpu.dma_semaphore, #tpu.memory_space<semaphore_mem>> -> memref<1x1x1x!tpu.dma_semaphore, #tpu.memory_space<semaphore_mem>>
      %205 = tpu.memref_squeeze %204 : memref<1x1x1x!tpu.dma_semaphore, #tpu.memory_space<semaphore_mem>> -> memref<!tpu.dma_semaphore, #tpu.memory_space<semaphore_mem>>
      tpu.enqueue_dma source(%201 : memref<1x128xf32, #tpu.memory_space<any>>) target(%203 : memref<1x128xf32, #tpu.memory_space<vmem>>) target_semaphore(%205 : memref<!tpu.dma_semaphore, #tpu.memory_space<semaphore_mem>>)
      %c6 = arith.constant 6 : index
      %206 = memref.load %arg1[%c6] : memref<8xi32, #tpu.memory_space<smem>>
      %c6_207 = arith.constant 6 : index
      %207 = memref.load %arg2[%c6_207] : memref<8xi32, #tpu.memory_space<smem>>
      %c0_i32_208 = arith.constant 0 : i32
      %c0_i32_209 = arith.constant 0 : i32
      %c0_i32_210 = arith.constant 0 : i32
      %c6_i32_211 = arith.constant 6 : i32
      %c0_i32_212 = arith.constant 0 : i32
      %208 = tpu.memref_slice %arg3[%206, %c0_i32_212] : memref<16x128xf32, #tpu.memory_space<any>> -> memref<1x128xf32, #tpu.memory_space<any>>
      %c6_i32_213 = arith.constant 6 : i32
      %c0_i32_214 = arith.constant 0 : i32
      %209 = tpu.memref_slice %arg8[%c0_i32_208, %c6_i32_213, %c0_i32_214] : memref<2x8x128xf32, #tpu.memory_space<vmem>> -> memref<1x1x128xf32, #tpu.memory_space<vmem>>
      %210 = tpu.memref_squeeze %209 : memref<1x1x128xf32, #tpu.memory_space<vmem>> -> memref<1x128xf32, #tpu.memory_space<vmem>>
      %211 = tpu.memref_slice %arg10[%c0_i32_209, %c0_i32_210, %c6_i32_211] : memref<2x2x8x!tpu.dma_semaphore, #tpu.memory_space<semaphore_mem>> -> memref<1x1x1x!tpu.dma_semaphore, #tpu.memory_space<semaphore_mem>>
      %212 = tpu.memref_squeeze %211 : memref<1x1x1x!tpu.dma_semaphore, #tpu.memory_space<semaphore_mem>> -> memref<!tpu.dma_semaphore, #tpu.memory_space<semaphore_mem>>
      tpu.enqueue_dma source(%208 : memref<1x128xf32, #tpu.memory_space<any>>) target(%210 : memref<1x128xf32, #tpu.memory_space<vmem>>) target_semaphore(%212 : memref<!tpu.dma_semaphore, #tpu.memory_space<semaphore_mem>>)
      %c0_i32_215 = arith.constant 0 : i32
      %c1_i32_216 = arith.constant 1 : i32
      %c0_i32_217 = arith.constant 0 : i32
      %c6_i32_218 = arith.constant 6 : i32
      %c0_i32_219 = arith.constant 0 : i32
      %213 = tpu.memref_slice %arg4[%207, %c0_i32_219] : memref<16x128xf32, #tpu.memory_space<any>> -> memref<1x128xf32, #tpu.memory_space<any>>
      %c6_i32_220 = arith.constant 6 : i32
      %c0_i32_221 = arith.constant 0 : i32
      %214 = tpu.memref_slice %arg9[%c0_i32_215, %c6_i32_220, %c0_i32_221] : memref<2x8x128xf32, #tpu.memory_space<vmem>> -> memref<1x1x128xf32, #tpu.memory_space<vmem>>
      %215 = tpu.memref_squeeze %214 : memref<1x1x128xf32, #tpu.memory_space<vmem>> -> memref<1x128xf32, #tpu.memory_space<vmem>>
      %216 = tpu.memref_slice %arg10[%c1_i32_216, %c0_i32_217, %c6_i32_218] : memref<2x2x8x!tpu.dma_semaphore, #tpu.memory_space<semaphore_mem>> -> memref<1x1x1x!tpu.dma_semaphore, #tpu.memory_space<semaphore_mem>>
      %217 = tpu.memref_squeeze %216 : memref<1x1x1x!tpu.dma_semaphore, #tpu.memory_space<semaphore_mem>> -> memref<!tpu.dma_semaphore, #tpu.memory_space<semaphore_mem>>
      tpu.enqueue_dma source(%213 : memref<1x128xf32, #tpu.memory_space<any>>) target(%215 : memref<1x128xf32, #tpu.memory_space<vmem>>) target_semaphore(%217 : memref<!tpu.dma_semaphore, #tpu.memory_space<semaphore_mem>>)
      %c7 = arith.constant 7 : index
      %218 = memref.load %arg1[%c7] : memref<8xi32, #tpu.memory_space<smem>>
      %c7_222 = arith.constant 7 : index
      %219 = memref.load %arg2[%c7_222] : memref<8xi32, #tpu.memory_space<smem>>
      %c0_i32_223 = arith.constant 0 : i32
      %c0_i32_224 = arith.constant 0 : i32
      %c0_i32_225 = arith.constant 0 : i32
      %c7_i32_226 = arith.constant 7 : i32
      %c0_i32_227 = arith.constant 0 : i32
      %220 = tpu.memref_slice %arg3[%218, %c0_i32_227] : memref<16x128xf32, #tpu.memory_space<any>> -> memref<1x128xf32, #tpu.memory_space<any>>
      %c7_i32_228 = arith.constant 7 : i32
      %c0_i32_229 = arith.constant 0 : i32
      %221 = tpu.memref_slice %arg8[%c0_i32_223, %c7_i32_228, %c0_i32_229] : memref<2x8x128xf32, #tpu.memory_space<vmem>> -> memref<1x1x128xf32, #tpu.memory_space<vmem>>
      %222 = tpu.memref_squeeze %221 : memref<1x1x128xf32, #tpu.memory_space<vmem>> -> memref<1x128xf32, #tpu.memory_space<vmem>>
      %223 = tpu.memref_slice %arg10[%c0_i32_224, %c0_i32_225, %c7_i32_226] : memref<2x2x8x!tpu.dma_semaphore, #tpu.memory_space<semaphore_mem>> -> memref<1x1x1x!tpu.dma_semaphore, #tpu.memory_space<semaphore_mem>>
      %224 = tpu.memref_squeeze %223 : memref<1x1x1x!tpu.dma_semaphore, #tpu.memory_space<semaphore_mem>> -> memref<!tpu.dma_semaphore, #tpu.memory_space<semaphore_mem>>
      tpu.enqueue_dma source(%220 : memref<1x128xf32, #tpu.memory_space<any>>) target(%222 : memref<1x128xf32, #tpu.memory_space<vmem>>) target_semaphore(%224 : memref<!tpu.dma_semaphore, #tpu.memory_space<semaphore_mem>>)
      %c0_i32_230 = arith.constant 0 : i32
      %c1_i32_231 = arith.constant 1 : i32
      %c0_i32_232 = arith.constant 0 : i32
      %c7_i32_233 = arith.constant 7 : i32
      %c0_i32_234 = arith.constant 0 : i32
      %225 = tpu.memref_slice %arg4[%219, %c0_i32_234] : memref<16x128xf32, #tpu.memory_space<any>> -> memref<1x128xf32, #tpu.memory_space<any>>
      %c7_i32_235 = arith.constant 7 : i32
      %c0_i32_236 = arith.constant 0 : i32
      %226 = tpu.memref_slice %arg9[%c0_i32_230, %c7_i32_235, %c0_i32_236] : memref<2x8x128xf32, #tpu.memory_space<vmem>> -> memref<1x1x128xf32, #tpu.memory_space<vmem>>
      %227 = tpu.memref_squeeze %226 : memref<1x1x128xf32, #tpu.memory_space<vmem>> -> memref<1x128xf32, #tpu.memory_space<vmem>>
      %228 = tpu.memref_slice %arg10[%c1_i32_231, %c0_i32_232, %c7_i32_233] : memref<2x2x8x!tpu.dma_semaphore, #tpu.memory_space<semaphore_mem>> -> memref<1x1x1x!tpu.dma_semaphore, #tpu.memory_space<semaphore_mem>>
      %229 = tpu.memref_squeeze %228 : memref<1x1x1x!tpu.dma_semaphore, #tpu.memory_space<semaphore_mem>> -> memref<!tpu.dma_semaphore, #tpu.memory_space<semaphore_mem>>
      tpu.enqueue_dma source(%225 : memref<1x128xf32, #tpu.memory_space<any>>) target(%227 : memref<1x128xf32, #tpu.memory_space<vmem>>) target_semaphore(%229 : memref<!tpu.dma_semaphore, #tpu.memory_space<semaphore_mem>>)
    } else {
    }
    %c1_i32 = arith.constant 1 : i32
    %3 = arith.andi %arg0, %c1_i32 : i32
    %c1_i32_1 = arith.constant 1 : i32
    %4 = arith.addi %arg0, %c1_i32_1 : i32
    %c1_i32_2 = arith.constant 1 : i32
    %5 = arith.cmpi slt, %4, %c1_i32_2 : i32
    %6 = arith.extui %5 : i1 to i32
    %c0_i32_3 = arith.constant 0 : i32
    %7 = arith.cmpi ne, %6, %c0_i32_3 : i32
    scf.if %7 {
      %c1_i32_113 = arith.constant 1 : i32
      %132 = arith.addi %arg0, %c1_i32_113 : i32
      %c1_i32_114 = arith.constant 1 : i32
      %133 = arith.subi %c1_i32_114, %3 : i32
      %c8_i32_115 = arith.constant 8 : i32
      %134 = arith.muli %132, %c8_i32_115 : i32
      %c0_i32_116 = arith.constant 0 : i32
      %135 = arith.addi %134, %c0_i32_116 : i32
      %136 = arith.index_cast %135 : i32 to index
      %137 = memref.load %arg1[%136] : memref<8xi32, #tpu.memory_space<smem>>
      %c0_i32_117 = arith.constant 0 : i32
      %138 = arith.addi %134, %c0_i32_117 : i32
      %139 = arith.index_cast %138 : i32 to index
      %140 = memref.load %arg2[%139] : memref<8xi32, #tpu.memory_space<smem>>
      %c0_i32_118 = arith.constant 0 : i32
      %c0_i32_119 = arith.constant 0 : i32
      %c0_i32_120 = arith.constant 0 : i32
      %141 = tpu.memref_slice %arg3[%137, %c0_i32_120] : memref<16x128xf32, #tpu.memory_space<any>> -> memref<1x128xf32, #tpu.memory_space<any>>
      %c0_i32_121 = arith.constant 0 : i32
      %c0_i32_122 = arith.constant 0 : i32
      %142 = tpu.memref_slice %arg8[%133, %c0_i32_121, %c0_i32_122] : memref<2x8x128xf32, #tpu.memory_space<vmem>> -> memref<1x1x128xf32, #tpu.memory_space<vmem>>
      %143 = tpu.memref_squeeze %142 : memref<1x1x128xf32, #tpu.memory_space<vmem>> -> memref<1x128xf32, #tpu.memory_space<vmem>>
      %144 = tpu.memref_slice %arg10[%c0_i32_118, %133, %c0_i32_119] : memref<2x2x8x!tpu.dma_semaphore, #tpu.memory_space<semaphore_mem>> -> memref<1x1x1x!tpu.dma_semaphore, #tpu.memory_space<semaphore_mem>>
      %145 = tpu.memref_squeeze %144 : memref<1x1x1x!tpu.dma_semaphore, #tpu.memory_space<semaphore_mem>> -> memref<!tpu.dma_semaphore, #tpu.memory_space<semaphore_mem>>
      tpu.enqueue_dma source(%141 : memref<1x128xf32, #tpu.memory_space<any>>) target(%143 : memref<1x128xf32, #tpu.memory_space<vmem>>) target_semaphore(%145 : memref<!tpu.dma_semaphore, #tpu.memory_space<semaphore_mem>>)
      %c1_i32_123 = arith.constant 1 : i32
      %c0_i32_124 = arith.constant 0 : i32
      %c0_i32_125 = arith.constant 0 : i32
      %146 = tpu.memref_slice %arg4[%140, %c0_i32_125] : memref<16x128xf32, #tpu.memory_space<any>> -> memref<1x128xf32, #tpu.memory_space<any>>
      %c0_i32_126 = arith.constant 0 : i32
      %c0_i32_127 = arith.constant 0 : i32
      %147 = tpu.memref_slice %arg9[%133, %c0_i32_126, %c0_i32_127] : memref<2x8x128xf32, #tpu.memory_space<vmem>> -> memref<1x1x128xf32, #tpu.memory_space<vmem>>
      %148 = tpu.memref_squeeze %147 : memref<1x1x128xf32, #tpu.memory_space<vmem>> -> memref<1x128xf32, #tpu.memory_space<vmem>>
      %149 = tpu.memref_slice %arg10[%c1_i32_123, %133, %c0_i32_124] : memref<2x2x8x!tpu.dma_semaphore, #tpu.memory_space<semaphore_mem>> -> memref<1x1x1x!tpu.dma_semaphore, #tpu.memory_space<semaphore_mem>>
      %150 = tpu.memref_squeeze %149 : memref<1x1x1x!tpu.dma_semaphore, #tpu.memory_space<semaphore_mem>> -> memref<!tpu.dma_semaphore, #tpu.memory_space<semaphore_mem>>
      tpu.enqueue_dma source(%146 : memref<1x128xf32, #tpu.memory_space<any>>) target(%148 : memref<1x128xf32, #tpu.memory_space<vmem>>) target_semaphore(%150 : memref<!tpu.dma_semaphore, #tpu.memory_space<semaphore_mem>>)
      %c1_i32_128 = arith.constant 1 : i32
      %151 = arith.addi %134, %c1_i32_128 : i32
      %152 = arith.index_cast %151 : i32 to index
      %153 = memref.load %arg1[%152] : memref<8xi32, #tpu.memory_space<smem>>
      %c1_i32_129 = arith.constant 1 : i32
      %154 = arith.addi %134, %c1_i32_129 : i32
      %155 = arith.index_cast %154 : i32 to index
      %156 = memref.load %arg2[%155] : memref<8xi32, #tpu.memory_space<smem>>
      %c0_i32_130 = arith.constant 0 : i32
      %c1_i32_131 = arith.constant 1 : i32
      %c0_i32_132 = arith.constant 0 : i32
      %157 = tpu.memref_slice %arg3[%153, %c0_i32_132] : memref<16x128xf32, #tpu.memory_space<any>> -> memref<1x128xf32, #tpu.memory_space<any>>
      %c1_i32_133 = arith.constant 1 : i32
      %c0_i32_134 = arith.constant 0 : i32
      %158 = tpu.memref_slice %arg8[%133, %c1_i32_133, %c0_i32_134] : memref<2x8x128xf32, #tpu.memory_space<vmem>> -> memref<1x1x128xf32, #tpu.memory_space<vmem>>
      %159 = tpu.memref_squeeze %158 : memref<1x1x128xf32, #tpu.memory_space<vmem>> -> memref<1x128xf32, #tpu.memory_space<vmem>>
      %160 = tpu.memref_slice %arg10[%c0_i32_130, %133, %c1_i32_131] : memref<2x2x8x!tpu.dma_semaphore, #tpu.memory_space<semaphore_mem>> -> memref<1x1x1x!tpu.dma_semaphore, #tpu.memory_space<semaphore_mem>>
      %161 = tpu.memref_squeeze %160 : memref<1x1x1x!tpu.dma_semaphore, #tpu.memory_space<semaphore_mem>> -> memref<!tpu.dma_semaphore, #tpu.memory_space<semaphore_mem>>
      tpu.enqueue_dma source(%157 : memref<1x128xf32, #tpu.memory_space<any>>) target(%159 : memref<1x128xf32, #tpu.memory_space<vmem>>) target_semaphore(%161 : memref<!tpu.dma_semaphore, #tpu.memory_space<semaphore_mem>>)
      %c1_i32_135 = arith.constant 1 : i32
      %c1_i32_136 = arith.constant 1 : i32
      %c0_i32_137 = arith.constant 0 : i32
      %162 = tpu.memref_slice %arg4[%156, %c0_i32_137] : memref<16x128xf32, #tpu.memory_space<any>> -> memref<1x128xf32, #tpu.memory_space<any>>
      %c1_i32_138 = arith.constant 1 : i32
      %c0_i32_139 = arith.constant 0 : i32
      %163 = tpu.memref_slice %arg9[%133, %c1_i32_138, %c0_i32_139] : memref<2x8x128xf32, #tpu.memory_space<vmem>> -> memref<1x1x128xf32, #tpu.memory_space<vmem>>
      %164 = tpu.memref_squeeze %163 : memref<1x1x128xf32, #tpu.memory_space<vmem>> -> memref<1x128xf32, #tpu.memory_space<vmem>>
      %165 = tpu.memref_slice %arg10[%c1_i32_135, %133, %c1_i32_136] : memref<2x2x8x!tpu.dma_semaphore, #tpu.memory_space<semaphore_mem>> -> memref<1x1x1x!tpu.dma_semaphore, #tpu.memory_space<semaphore_mem>>
      %166 = tpu.memref_squeeze %165 : memref<1x1x1x!tpu.dma_semaphore, #tpu.memory_space<semaphore_mem>> -> memref<!tpu.dma_semaphore, #tpu.memory_space<semaphore_mem>>
      tpu.enqueue_dma source(%162 : memref<1x128xf32, #tpu.memory_space<any>>) target(%164 : memref<1x128xf32, #tpu.memory_space<vmem>>) target_semaphore(%166 : memref<!tpu.dma_semaphore, #tpu.memory_space<semaphore_mem>>)
      %c2_i32_140 = arith.constant 2 : i32
      %167 = arith.addi %134, %c2_i32_140 : i32
      %168 = arith.index_cast %167 : i32 to index
      %169 = memref.load %arg1[%168] : memref<8xi32, #tpu.memory_space<smem>>
      %c2_i32_141 = arith.constant 2 : i32
      %170 = arith.addi %134, %c2_i32_141 : i32
      %171 = arith.index_cast %170 : i32 to index
      %172 = memref.load %arg2[%171] : memref<8xi32, #tpu.memory_space<smem>>
      %c0_i32_142 = arith.constant 0 : i32
      %c2_i32_143 = arith.constant 2 : i32
      %c0_i32_144 = arith.constant 0 : i32
      %173 = tpu.memref_slice %arg3[%169, %c0_i32_144] : memref<16x128xf32, #tpu.memory_space<any>> -> memref<1x128xf32, #tpu.memory_space<any>>
      %c2_i32_145 = arith.constant 2 : i32
      %c0_i32_146 = arith.constant 0 : i32
      %174 = tpu.memref_slice %arg8[%133, %c2_i32_145, %c0_i32_146] : memref<2x8x128xf32, #tpu.memory_space<vmem>> -> memref<1x1x128xf32, #tpu.memory_space<vmem>>
      %175 = tpu.memref_squeeze %174 : memref<1x1x128xf32, #tpu.memory_space<vmem>> -> memref<1x128xf32, #tpu.memory_space<vmem>>
      %176 = tpu.memref_slice %arg10[%c0_i32_142, %133, %c2_i32_143] : memref<2x2x8x!tpu.dma_semaphore, #tpu.memory_space<semaphore_mem>> -> memref<1x1x1x!tpu.dma_semaphore, #tpu.memory_space<semaphore_mem>>
      %177 = tpu.memref_squeeze %176 : memref<1x1x1x!tpu.dma_semaphore, #tpu.memory_space<semaphore_mem>> -> memref<!tpu.dma_semaphore, #tpu.memory_space<semaphore_mem>>
      tpu.enqueue_dma source(%173 : memref<1x128xf32, #tpu.memory_space<any>>) target(%175 : memref<1x128xf32, #tpu.memory_space<vmem>>) target_semaphore(%177 : memref<!tpu.dma_semaphore, #tpu.memory_space<semaphore_mem>>)
      %c1_i32_147 = arith.constant 1 : i32
      %c2_i32_148 = arith.constant 2 : i32
      %c0_i32_149 = arith.constant 0 : i32
      %178 = tpu.memref_slice %arg4[%172, %c0_i32_149] : memref<16x128xf32, #tpu.memory_space<any>> -> memref<1x128xf32, #tpu.memory_space<any>>
      %c2_i32_150 = arith.constant 2 : i32
      %c0_i32_151 = arith.constant 0 : i32
      %179 = tpu.memref_slice %arg9[%133, %c2_i32_150, %c0_i32_151] : memref<2x8x128xf32, #tpu.memory_space<vmem>> -> memref<1x1x128xf32, #tpu.memory_space<vmem>>
      %180 = tpu.memref_squeeze %179 : memref<1x1x128xf32, #tpu.memory_space<vmem>> -> memref<1x128xf32, #tpu.memory_space<vmem>>
      %181 = tpu.memref_slice %arg10[%c1_i32_147, %133, %c2_i32_148] : memref<2x2x8x!tpu.dma_semaphore, #tpu.memory_space<semaphore_mem>> -> memref<1x1x1x!tpu.dma_semaphore, #tpu.memory_space<semaphore_mem>>
      %182 = tpu.memref_squeeze %181 : memref<1x1x1x!tpu.dma_semaphore, #tpu.memory_space<semaphore_mem>> -> memref<!tpu.dma_semaphore, #tpu.memory_space<semaphore_mem>>
      tpu.enqueue_dma source(%178 : memref<1x128xf32, #tpu.memory_space<any>>) target(%180 : memref<1x128xf32, #tpu.memory_space<vmem>>) target_semaphore(%182 : memref<!tpu.dma_semaphore, #tpu.memory_space<semaphore_mem>>)
      %c3_i32_152 = arith.constant 3 : i32
      %183 = arith.addi %134, %c3_i32_152 : i32
      %184 = arith.index_cast %183 : i32 to index
      %185 = memref.load %arg1[%184] : memref<8xi32, #tpu.memory_space<smem>>
      %c3_i32_153 = arith.constant 3 : i32
      %186 = arith.addi %134, %c3_i32_153 : i32
      %187 = arith.index_cast %186 : i32 to index
      %188 = memref.load %arg2[%187] : memref<8xi32, #tpu.memory_space<smem>>
      %c0_i32_154 = arith.constant 0 : i32
      %c3_i32_155 = arith.constant 3 : i32
      %c0_i32_156 = arith.constant 0 : i32
      %189 = tpu.memref_slice %arg3[%185, %c0_i32_156] : memref<16x128xf32, #tpu.memory_space<any>> -> memref<1x128xf32, #tpu.memory_space<any>>
      %c3_i32_157 = arith.constant 3 : i32
      %c0_i32_158 = arith.constant 0 : i32
      %190 = tpu.memref_slice %arg8[%133, %c3_i32_157, %c0_i32_158] : memref<2x8x128xf32, #tpu.memory_space<vmem>> -> memref<1x1x128xf32, #tpu.memory_space<vmem>>
      %191 = tpu.memref_squeeze %190 : memref<1x1x128xf32, #tpu.memory_space<vmem>> -> memref<1x128xf32, #tpu.memory_space<vmem>>
      %192 = tpu.memref_slice %arg10[%c0_i32_154, %133, %c3_i32_155] : memref<2x2x8x!tpu.dma_semaphore, #tpu.memory_space<semaphore_mem>> -> memref<1x1x1x!tpu.dma_semaphore, #tpu.memory_space<semaphore_mem>>
      %193 = tpu.memref_squeeze %192 : memref<1x1x1x!tpu.dma_semaphore, #tpu.memory_space<semaphore_mem>> -> memref<!tpu.dma_semaphore, #tpu.memory_space<semaphore_mem>>
      tpu.enqueue_dma source(%189 : memref<1x128xf32, #tpu.memory_space<any>>) target(%191 : memref<1x128xf32, #tpu.memory_space<vmem>>) target_semaphore(%193 : memref<!tpu.dma_semaphore, #tpu.memory_space<semaphore_mem>>)
      %c1_i32_159 = arith.constant 1 : i32
      %c3_i32_160 = arith.constant 3 : i32
      %c0_i32_161 = arith.constant 0 : i32
      %194 = tpu.memref_slice %arg4[%188, %c0_i32_161] : memref<16x128xf32, #tpu.memory_space<any>> -> memref<1x128xf32, #tpu.memory_space<any>>
      %c3_i32_162 = arith.constant 3 : i32
      %c0_i32_163 = arith.constant 0 : i32
      %195 = tpu.memref_slice %arg9[%133, %c3_i32_162, %c0_i32_163] : memref<2x8x128xf32, #tpu.memory_space<vmem>> -> memref<1x1x128xf32, #tpu.memory_space<vmem>>
      %196 = tpu.memref_squeeze %195 : memref<1x1x128xf32, #tpu.memory_space<vmem>> -> memref<1x128xf32, #tpu.memory_space<vmem>>
      %197 = tpu.memref_slice %arg10[%c1_i32_159, %133, %c3_i32_160] : memref<2x2x8x!tpu.dma_semaphore, #tpu.memory_space<semaphore_mem>> -> memref<1x1x1x!tpu.dma_semaphore, #tpu.memory_space<semaphore_mem>>
      %198 = tpu.memref_squeeze %197 : memref<1x1x1x!tpu.dma_semaphore, #tpu.memory_space<semaphore_mem>> -> memref<!tpu.dma_semaphore, #tpu.memory_space<semaphore_mem>>
      tpu.enqueue_dma source(%194 : memref<1x128xf32, #tpu.memory_space<any>>) target(%196 : memref<1x128xf32, #tpu.memory_space<vmem>>) target_semaphore(%198 : memref<!tpu.dma_semaphore, #tpu.memory_space<semaphore_mem>>)
      %c4_i32_164 = arith.constant 4 : i32
      %199 = arith.addi %134, %c4_i32_164 : i32
      %200 = arith.index_cast %199 : i32 to index
      %201 = memref.load %arg1[%200] : memref<8xi32, #tpu.memory_space<smem>>
      %c4_i32_165 = arith.constant 4 : i32
      %202 = arith.addi %134, %c4_i32_165 : i32
      %203 = arith.index_cast %202 : i32 to index
      %204 = memref.load %arg2[%203] : memref<8xi32, #tpu.memory_space<smem>>
      %c0_i32_166 = arith.constant 0 : i32
      %c4_i32_167 = arith.constant 4 : i32
      %c0_i32_168 = arith.constant 0 : i32
      %205 = tpu.memref_slice %arg3[%201, %c0_i32_168] : memref<16x128xf32, #tpu.memory_space<any>> -> memref<1x128xf32, #tpu.memory_space<any>>
      %c4_i32_169 = arith.constant 4 : i32
      %c0_i32_170 = arith.constant 0 : i32
      %206 = tpu.memref_slice %arg8[%133, %c4_i32_169, %c0_i32_170] : memref<2x8x128xf32, #tpu.memory_space<vmem>> -> memref<1x1x128xf32, #tpu.memory_space<vmem>>
      %207 = tpu.memref_squeeze %206 : memref<1x1x128xf32, #tpu.memory_space<vmem>> -> memref<1x128xf32, #tpu.memory_space<vmem>>
      %208 = tpu.memref_slice %arg10[%c0_i32_166, %133, %c4_i32_167] : memref<2x2x8x!tpu.dma_semaphore, #tpu.memory_space<semaphore_mem>> -> memref<1x1x1x!tpu.dma_semaphore, #tpu.memory_space<semaphore_mem>>
      %209 = tpu.memref_squeeze %208 : memref<1x1x1x!tpu.dma_semaphore, #tpu.memory_space<semaphore_mem>> -> memref<!tpu.dma_semaphore, #tpu.memory_space<semaphore_mem>>
      tpu.enqueue_dma source(%205 : memref<1x128xf32, #tpu.memory_space<any>>) target(%207 : memref<1x128xf32, #tpu.memory_space<vmem>>) target_semaphore(%209 : memref<!tpu.dma_semaphore, #tpu.memory_space<semaphore_mem>>)
      %c1_i32_171 = arith.constant 1 : i32
      %c4_i32_172 = arith.constant 4 : i32
      %c0_i32_173 = arith.constant 0 : i32
      %210 = tpu.memref_slice %arg4[%204, %c0_i32_173] : memref<16x128xf32, #tpu.memory_space<any>> -> memref<1x128xf32, #tpu.memory_space<any>>
      %c4_i32_174 = arith.constant 4 : i32
      %c0_i32_175 = arith.constant 0 : i32
      %211 = tpu.memref_slice %arg9[%133, %c4_i32_174, %c0_i32_175] : memref<2x8x128xf32, #tpu.memory_space<vmem>> -> memref<1x1x128xf32, #tpu.memory_space<vmem>>
      %212 = tpu.memref_squeeze %211 : memref<1x1x128xf32, #tpu.memory_space<vmem>> -> memref<1x128xf32, #tpu.memory_space<vmem>>
      %213 = tpu.memref_slice %arg10[%c1_i32_171, %133, %c4_i32_172] : memref<2x2x8x!tpu.dma_semaphore, #tpu.memory_space<semaphore_mem>> -> memref<1x1x1x!tpu.dma_semaphore, #tpu.memory_space<semaphore_mem>>
      %214 = tpu.memref_squeeze %213 : memref<1x1x1x!tpu.dma_semaphore, #tpu.memory_space<semaphore_mem>> -> memref<!tpu.dma_semaphore, #tpu.memory_space<semaphore_mem>>
      tpu.enqueue_dma source(%210 : memref<1x128xf32, #tpu.memory_space<any>>) target(%212 : memref<1x128xf32, #tpu.memory_space<vmem>>) target_semaphore(%214 : memref<!tpu.dma_semaphore, #tpu.memory_space<semaphore_mem>>)
      %c5_i32_176 = arith.constant 5 : i32
      %215 = arith.addi %134, %c5_i32_176 : i32
      %216 = arith.index_cast %215 : i32 to index
      %217 = memref.load %arg1[%216] : memref<8xi32, #tpu.memory_space<smem>>
      %c5_i32_177 = arith.constant 5 : i32
      %218 = arith.addi %134, %c5_i32_177 : i32
      %219 = arith.index_cast %218 : i32 to index
      %220 = memref.load %arg2[%219] : memref<8xi32, #tpu.memory_space<smem>>
      %c0_i32_178 = arith.constant 0 : i32
      %c5_i32_179 = arith.constant 5 : i32
      %c0_i32_180 = arith.constant 0 : i32
      %221 = tpu.memref_slice %arg3[%217, %c0_i32_180] : memref<16x128xf32, #tpu.memory_space<any>> -> memref<1x128xf32, #tpu.memory_space<any>>
      %c5_i32_181 = arith.constant 5 : i32
      %c0_i32_182 = arith.constant 0 : i32
      %222 = tpu.memref_slice %arg8[%133, %c5_i32_181, %c0_i32_182] : memref<2x8x128xf32, #tpu.memory_space<vmem>> -> memref<1x1x128xf32, #tpu.memory_space<vmem>>
      %223 = tpu.memref_squeeze %222 : memref<1x1x128xf32, #tpu.memory_space<vmem>> -> memref<1x128xf32, #tpu.memory_space<vmem>>
      %224 = tpu.memref_slice %arg10[%c0_i32_178, %133, %c5_i32_179] : memref<2x2x8x!tpu.dma_semaphore, #tpu.memory_space<semaphore_mem>> -> memref<1x1x1x!tpu.dma_semaphore, #tpu.memory_space<semaphore_mem>>
      %225 = tpu.memref_squeeze %224 : memref<1x1x1x!tpu.dma_semaphore, #tpu.memory_space<semaphore_mem>> -> memref<!tpu.dma_semaphore, #tpu.memory_space<semaphore_mem>>
      tpu.enqueue_dma source(%221 : memref<1x128xf32, #tpu.memory_space<any>>) target(%223 : memref<1x128xf32, #tpu.memory_space<vmem>>) target_semaphore(%225 : memref<!tpu.dma_semaphore, #tpu.memory_space<semaphore_mem>>)
      %c1_i32_183 = arith.constant 1 : i32
      %c5_i32_184 = arith.constant 5 : i32
      %c0_i32_185 = arith.constant 0 : i32
      %226 = tpu.memref_slice %arg4[%220, %c0_i32_185] : memref<16x128xf32, #tpu.memory_space<any>> -> memref<1x128xf32, #tpu.memory_space<any>>
      %c5_i32_186 = arith.constant 5 : i32
      %c0_i32_187 = arith.constant 0 : i32
      %227 = tpu.memref_slice %arg9[%133, %c5_i32_186, %c0_i32_187] : memref<2x8x128xf32, #tpu.memory_space<vmem>> -> memref<1x1x128xf32, #tpu.memory_space<vmem>>
      %228 = tpu.memref_squeeze %227 : memref<1x1x128xf32, #tpu.memory_space<vmem>> -> memref<1x128xf32, #tpu.memory_space<vmem>>
      %229 = tpu.memref_slice %arg10[%c1_i32_183, %133, %c5_i32_184] : memref<2x2x8x!tpu.dma_semaphore, #tpu.memory_space<semaphore_mem>> -> memref<1x1x1x!tpu.dma_semaphore, #tpu.memory_space<semaphore_mem>>
      %230 = tpu.memref_squeeze %229 : memref<1x1x1x!tpu.dma_semaphore, #tpu.memory_space<semaphore_mem>> -> memref<!tpu.dma_semaphore, #tpu.memory_space<semaphore_mem>>
      tpu.enqueue_dma source(%226 : memref<1x128xf32, #tpu.memory_space<any>>) target(%228 : memref<1x128xf32, #tpu.memory_space<vmem>>) target_semaphore(%230 : memref<!tpu.dma_semaphore, #tpu.memory_space<semaphore_mem>>)
      %c6_i32_188 = arith.constant 6 : i32
      %231 = arith.addi %134, %c6_i32_188 : i32
      %232 = arith.index_cast %231 : i32 to index
      %233 = memref.load %arg1[%232] : memref<8xi32, #tpu.memory_space<smem>>
      %c6_i32_189 = arith.constant 6 : i32
      %234 = arith.addi %134, %c6_i32_189 : i32
      %235 = arith.index_cast %234 : i32 to index
      %236 = memref.load %arg2[%235] : memref<8xi32, #tpu.memory_space<smem>>
      %c0_i32_190 = arith.constant 0 : i32
      %c6_i32_191 = arith.constant 6 : i32
      %c0_i32_192 = arith.constant 0 : i32
      %237 = tpu.memref_slice %arg3[%233, %c0_i32_192] : memref<16x128xf32, #tpu.memory_space<any>> -> memref<1x128xf32, #tpu.memory_space<any>>
      %c6_i32_193 = arith.constant 6 : i32
      %c0_i32_194 = arith.constant 0 : i32
      %238 = tpu.memref_slice %arg8[%133, %c6_i32_193, %c0_i32_194] : memref<2x8x128xf32, #tpu.memory_space<vmem>> -> memref<1x1x128xf32, #tpu.memory_space<vmem>>
      %239 = tpu.memref_squeeze %238 : memref<1x1x128xf32, #tpu.memory_space<vmem>> -> memref<1x128xf32, #tpu.memory_space<vmem>>
      %240 = tpu.memref_slice %arg10[%c0_i32_190, %133, %c6_i32_191] : memref<2x2x8x!tpu.dma_semaphore, #tpu.memory_space<semaphore_mem>> -> memref<1x1x1x!tpu.dma_semaphore, #tpu.memory_space<semaphore_mem>>
      %241 = tpu.memref_squeeze %240 : memref<1x1x1x!tpu.dma_semaphore, #tpu.memory_space<semaphore_mem>> -> memref<!tpu.dma_semaphore, #tpu.memory_space<semaphore_mem>>
      tpu.enqueue_dma source(%237 : memref<1x128xf32, #tpu.memory_space<any>>) target(%239 : memref<1x128xf32, #tpu.memory_space<vmem>>) target_semaphore(%241 : memref<!tpu.dma_semaphore, #tpu.memory_space<semaphore_mem>>)
      %c1_i32_195 = arith.constant 1 : i32
      %c6_i32_196 = arith.constant 6 : i32
      %c0_i32_197 = arith.constant 0 : i32
      %242 = tpu.memref_slice %arg4[%236, %c0_i32_197] : memref<16x128xf32, #tpu.memory_space<any>> -> memref<1x128xf32, #tpu.memory_space<any>>
      %c6_i32_198 = arith.constant 6 : i32
      %c0_i32_199 = arith.constant 0 : i32
      %243 = tpu.memref_slice %arg9[%133, %c6_i32_198, %c0_i32_199] : memref<2x8x128xf32, #tpu.memory_space<vmem>> -> memref<1x1x128xf32, #tpu.memory_space<vmem>>
      %244 = tpu.memref_squeeze %243 : memref<1x1x128xf32, #tpu.memory_space<vmem>> -> memref<1x128xf32, #tpu.memory_space<vmem>>
      %245 = tpu.memref_slice %arg10[%c1_i32_195, %133, %c6_i32_196] : memref<2x2x8x!tpu.dma_semaphore, #tpu.memory_space<semaphore_mem>> -> memref<1x1x1x!tpu.dma_semaphore, #tpu.memory_space<semaphore_mem>>
      %246 = tpu.memref_squeeze %245 : memref<1x1x1x!tpu.dma_semaphore, #tpu.memory_space<semaphore_mem>> -> memref<!tpu.dma_semaphore, #tpu.memory_space<semaphore_mem>>
      tpu.enqueue_dma source(%242 : memref<1x128xf32, #tpu.memory_space<any>>) target(%244 : memref<1x128xf32, #tpu.memory_space<vmem>>) target_semaphore(%246 : memref<!tpu.dma_semaphore, #tpu.memory_space<semaphore_mem>>)
      %c7_i32_200 = arith.constant 7 : i32
      %247 = arith.addi %134, %c7_i32_200 : i32
      %248 = arith.index_cast %247 : i32 to index
      %249 = memref.load %arg1[%248] : memref<8xi32, #tpu.memory_space<smem>>
      %c7_i32_201 = arith.constant 7 : i32
      %250 = arith.addi %134, %c7_i32_201 : i32
      %251 = arith.index_cast %250 : i32 to index
      %252 = memref.load %arg2[%251] : memref<8xi32, #tpu.memory_space<smem>>
      %c0_i32_202 = arith.constant 0 : i32
      %c7_i32_203 = arith.constant 7 : i32
      %c0_i32_204 = arith.constant 0 : i32
      %253 = tpu.memref_slice %arg3[%249, %c0_i32_204] : memref<16x128xf32, #tpu.memory_space<any>> -> memref<1x128xf32, #tpu.memory_space<any>>
      %c7_i32_205 = arith.constant 7 : i32
      %c0_i32_206 = arith.constant 0 : i32
      %254 = tpu.memref_slice %arg8[%133, %c7_i32_205, %c0_i32_206] : memref<2x8x128xf32, #tpu.memory_space<vmem>> -> memref<1x1x128xf32, #tpu.memory_space<vmem>>
      %255 = tpu.memref_squeeze %254 : memref<1x1x128xf32, #tpu.memory_space<vmem>> -> memref<1x128xf32, #tpu.memory_space<vmem>>
      %256 = tpu.memref_slice %arg10[%c0_i32_202, %133, %c7_i32_203] : memref<2x2x8x!tpu.dma_semaphore, #tpu.memory_space<semaphore_mem>> -> memref<1x1x1x!tpu.dma_semaphore, #tpu.memory_space<semaphore_mem>>
      %257 = tpu.memref_squeeze %256 : memref<1x1x1x!tpu.dma_semaphore, #tpu.memory_space<semaphore_mem>> -> memref<!tpu.dma_semaphore, #tpu.memory_space<semaphore_mem>>
      tpu.enqueue_dma source(%253 : memref<1x128xf32, #tpu.memory_space<any>>) target(%255 : memref<1x128xf32, #tpu.memory_space<vmem>>) target_semaphore(%257 : memref<!tpu.dma_semaphore, #tpu.memory_space<semaphore_mem>>)
      %c1_i32_207 = arith.constant 1 : i32
      %c7_i32_208 = arith.constant 7 : i32
      %c0_i32_209 = arith.constant 0 : i32
      %258 = tpu.memref_slice %arg4[%252, %c0_i32_209] : memref<16x128xf32, #tpu.memory_space<any>> -> memref<1x128xf32, #tpu.memory_space<any>>
      %c7_i32_210 = arith.constant 7 : i32
      %c0_i32_211 = arith.constant 0 : i32
      %259 = tpu.memref_slice %arg9[%133, %c7_i32_210, %c0_i32_211] : memref<2x8x128xf32, #tpu.memory_space<vmem>> -> memref<1x1x128xf32, #tpu.memory_space<vmem>>
      %260 = tpu.memref_squeeze %259 : memref<1x1x128xf32, #tpu.memory_space<vmem>> -> memref<1x128xf32, #tpu.memory_space<vmem>>
      %261 = tpu.memref_slice %arg10[%c1_i32_207, %133, %c7_i32_208] : memref<2x2x8x!tpu.dma_semaphore, #tpu.memory_space<semaphore_mem>> -> memref<1x1x1x!tpu.dma_semaphore, #tpu.memory_space<semaphore_mem>>
      %262 = tpu.memref_squeeze %261 : memref<1x1x1x!tpu.dma_semaphore, #tpu.memory_space<semaphore_mem>> -> memref<!tpu.dma_semaphore, #tpu.memory_space<semaphore_mem>>
      tpu.enqueue_dma source(%258 : memref<1x128xf32, #tpu.memory_space<any>>) target(%260 : memref<1x128xf32, #tpu.memory_space<vmem>>) target_semaphore(%262 : memref<!tpu.dma_semaphore, #tpu.memory_space<semaphore_mem>>)
    } else {
    }
    %c0_i32_4 = arith.constant 0 : i32
    %c0_i32_5 = arith.constant 0 : i32
    %c0_i32_6 = arith.constant 0 : i32
    %c0_i32_7 = arith.constant 0 : i32
    %8 = tpu.memref_slice %arg3[%c0_i32_6, %c0_i32_7] : memref<16x128xf32, #tpu.memory_space<any>> -> memref<1x128xf32, #tpu.memory_space<any>>
    %c0_i32_8 = arith.constant 0 : i32
    %c0_i32_9 = arith.constant 0 : i32
    %9 = tpu.memref_slice %arg8[%3, %c0_i32_8, %c0_i32_9] : memref<2x8x128xf32, #tpu.memory_space<vmem>> -> memref<1x1x128xf32, #tpu.memory_space<vmem>>
    %10 = tpu.memref_squeeze %9 : memref<1x1x128xf32, #tpu.memory_space<vmem>> -> memref<1x128xf32, #tpu.memory_space<vmem>>
    %11 = tpu.memref_slice %arg10[%c0_i32_4, %3, %c0_i32_5] : memref<2x2x8x!tpu.dma_semaphore, #tpu.memory_space<semaphore_mem>> -> memref<1x1x1x!tpu.dma_semaphore, #tpu.memory_space<semaphore_mem>>
    %12 = tpu.memref_squeeze %11 : memref<1x1x1x!tpu.dma_semaphore, #tpu.memory_space<semaphore_mem>> -> memref<!tpu.dma_semaphore, #tpu.memory_space<semaphore_mem>>
    tpu.wait_dma2 semaphore(%12 : memref<!tpu.dma_semaphore, #tpu.memory_space<semaphore_mem>>) src(%8 : memref<1x128xf32, #tpu.memory_space<any>>) dst(%10 : memref<1x128xf32, #tpu.memory_space<vmem>>)
    %c1_i32_10 = arith.constant 1 : i32
    %c0_i32_11 = arith.constant 0 : i32
    %c0_i32_12 = arith.constant 0 : i32
    %c0_i32_13 = arith.constant 0 : i32
    %13 = tpu.memref_slice %arg4[%c0_i32_12, %c0_i32_13] : memref<16x128xf32, #tpu.memory_space<any>> -> memref<1x128xf32, #tpu.memory_space<any>>
    %c0_i32_14 = arith.constant 0 : i32
    %c0_i32_15 = arith.constant 0 : i32
    %14 = tpu.memref_slice %arg9[%3, %c0_i32_14, %c0_i32_15] : memref<2x8x128xf32, #tpu.memory_space<vmem>> -> memref<1x1x128xf32, #tpu.memory_space<vmem>>
    %15 = tpu.memref_squeeze %14 : memref<1x1x128xf32, #tpu.memory_space<vmem>> -> memref<1x128xf32, #tpu.memory_space<vmem>>
    %16 = tpu.memref_slice %arg10[%c1_i32_10, %3, %c0_i32_11] : memref<2x2x8x!tpu.dma_semaphore, #tpu.memory_space<semaphore_mem>> -> memref<1x1x1x!tpu.dma_semaphore, #tpu.memory_space<semaphore_mem>>
    %17 = tpu.memref_squeeze %16 : memref<1x1x1x!tpu.dma_semaphore, #tpu.memory_space<semaphore_mem>> -> memref<!tpu.dma_semaphore, #tpu.memory_space<semaphore_mem>>
    tpu.wait_dma2 semaphore(%17 : memref<!tpu.dma_semaphore, #tpu.memory_space<semaphore_mem>>) src(%13 : memref<1x128xf32, #tpu.memory_space<any>>) dst(%15 : memref<1x128xf32, #tpu.memory_space<vmem>>)
    %c0_i32_16 = arith.constant 0 : i32
    %c1_i32_17 = arith.constant 1 : i32
    %c0_i32_18 = arith.constant 0 : i32
    %c0_i32_19 = arith.constant 0 : i32
    %18 = tpu.memref_slice %arg3[%c0_i32_18, %c0_i32_19] : memref<16x128xf32, #tpu.memory_space<any>> -> memref<1x128xf32, #tpu.memory_space<any>>
    %c1_i32_20 = arith.constant 1 : i32
    %c0_i32_21 = arith.constant 0 : i32
    %19 = tpu.memref_slice %arg8[%3, %c1_i32_20, %c0_i32_21] : memref<2x8x128xf32, #tpu.memory_space<vmem>> -> memref<1x1x128xf32, #tpu.memory_space<vmem>>
    %20 = tpu.memref_squeeze %19 : memref<1x1x128xf32, #tpu.memory_space<vmem>> -> memref<1x128xf32, #tpu.memory_space<vmem>>
    %21 = tpu.memref_slice %arg10[%c0_i32_16, %3, %c1_i32_17] : memref<2x2x8x!tpu.dma_semaphore, #tpu.memory_space<semaphore_mem>> -> memref<1x1x1x!tpu.dma_semaphore, #tpu.memory_space<semaphore_mem>>
    %22 = tpu.memref_squeeze %21 : memref<1x1x1x!tpu.dma_semaphore, #tpu.memory_space<semaphore_mem>> -> memref<!tpu.dma_semaphore, #tpu.memory_space<semaphore_mem>>
    tpu.wait_dma2 semaphore(%22 : memref<!tpu.dma_semaphore, #tpu.memory_space<semaphore_mem>>) src(%18 : memref<1x128xf32, #tpu.memory_space<any>>) dst(%20 : memref<1x128xf32, #tpu.memory_space<vmem>>)
    %c1_i32_22 = arith.constant 1 : i32
    %c1_i32_23 = arith.constant 1 : i32
    %c0_i32_24 = arith.constant 0 : i32
    %c0_i32_25 = arith.constant 0 : i32
    %23 = tpu.memref_slice %arg4[%c0_i32_24, %c0_i32_25] : memref<16x128xf32, #tpu.memory_space<any>> -> memref<1x128xf32, #tpu.memory_space<any>>
    %c1_i32_26 = arith.constant 1 : i32
    %c0_i32_27 = arith.constant 0 : i32
    %24 = tpu.memref_slice %arg9[%3, %c1_i32_26, %c0_i32_27] : memref<2x8x128xf32, #tpu.memory_space<vmem>> -> memref<1x1x128xf32, #tpu.memory_space<vmem>>
    %25 = tpu.memref_squeeze %24 : memref<1x1x128xf32, #tpu.memory_space<vmem>> -> memref<1x128xf32, #tpu.memory_space<vmem>>
    %26 = tpu.memref_slice %arg10[%c1_i32_22, %3, %c1_i32_23] : memref<2x2x8x!tpu.dma_semaphore, #tpu.memory_space<semaphore_mem>> -> memref<1x1x1x!tpu.dma_semaphore, #tpu.memory_space<semaphore_mem>>
    %27 = tpu.memref_squeeze %26 : memref<1x1x1x!tpu.dma_semaphore, #tpu.memory_space<semaphore_mem>> -> memref<!tpu.dma_semaphore, #tpu.memory_space<semaphore_mem>>
    tpu.wait_dma2 semaphore(%27 : memref<!tpu.dma_semaphore, #tpu.memory_space<semaphore_mem>>) src(%23 : memref<1x128xf32, #tpu.memory_space<any>>) dst(%25 : memref<1x128xf32, #tpu.memory_space<vmem>>)
    %c0_i32_28 = arith.constant 0 : i32
    %c2_i32 = arith.constant 2 : i32
    %c0_i32_29 = arith.constant 0 : i32
    %c0_i32_30 = arith.constant 0 : i32
    %28 = tpu.memref_slice %arg3[%c0_i32_29, %c0_i32_30] : memref<16x128xf32, #tpu.memory_space<any>> -> memref<1x128xf32, #tpu.memory_space<any>>
    %c2_i32_31 = arith.constant 2 : i32
    %c0_i32_32 = arith.constant 0 : i32
    %29 = tpu.memref_slice %arg8[%3, %c2_i32_31, %c0_i32_32] : memref<2x8x128xf32, #tpu.memory_space<vmem>> -> memref<1x1x128xf32, #tpu.memory_space<vmem>>
    %30 = tpu.memref_squeeze %29 : memref<1x1x128xf32, #tpu.memory_space<vmem>> -> memref<1x128xf32, #tpu.memory_space<vmem>>
    %31 = tpu.memref_slice %arg10[%c0_i32_28, %3, %c2_i32] : memref<2x2x8x!tpu.dma_semaphore, #tpu.memory_space<semaphore_mem>> -> memref<1x1x1x!tpu.dma_semaphore, #tpu.memory_space<semaphore_mem>>
    %32 = tpu.memref_squeeze %31 : memref<1x1x1x!tpu.dma_semaphore, #tpu.memory_space<semaphore_mem>> -> memref<!tpu.dma_semaphore, #tpu.memory_space<semaphore_mem>>
    tpu.wait_dma2 semaphore(%32 : memref<!tpu.dma_semaphore, #tpu.memory_space<semaphore_mem>>) src(%28 : memref<1x128xf32, #tpu.memory_space<any>>) dst(%30 : memref<1x128xf32, #tpu.memory_space<vmem>>)
    %c1_i32_33 = arith.constant 1 : i32
    %c2_i32_34 = arith.constant 2 : i32
    %c0_i32_35 = arith.constant 0 : i32
    %c0_i32_36 = arith.constant 0 : i32
    %33 = tpu.memref_slice %arg4[%c0_i32_35, %c0_i32_36] : memref<16x128xf32, #tpu.memory_space<any>> -> memref<1x128xf32, #tpu.memory_space<any>>
    %c2_i32_37 = arith.constant 2 : i32
    %c0_i32_38 = arith.constant 0 : i32
    %34 = tpu.memref_slice %arg9[%3, %c2_i32_37, %c0_i32_38] : memref<2x8x128xf32, #tpu.memory_space<vmem>> -> memref<1x1x128xf32, #tpu.memory_space<vmem>>
    %35 = tpu.memref_squeeze %34 : memref<1x1x128xf32, #tpu.memory_space<vmem>> -> memref<1x128xf32, #tpu.memory_space<vmem>>
    %36 = tpu.memref_slice %arg10[%c1_i32_33, %3, %c2_i32_34] : memref<2x2x8x!tpu.dma_semaphore, #tpu.memory_space<semaphore_mem>> -> memref<1x1x1x!tpu.dma_semaphore, #tpu.memory_space<semaphore_mem>>
    %37 = tpu.memref_squeeze %36 : memref<1x1x1x!tpu.dma_semaphore, #tpu.memory_space<semaphore_mem>> -> memref<!tpu.dma_semaphore, #tpu.memory_space<semaphore_mem>>
    tpu.wait_dma2 semaphore(%37 : memref<!tpu.dma_semaphore, #tpu.memory_space<semaphore_mem>>) src(%33 : memref<1x128xf32, #tpu.memory_space<any>>) dst(%35 : memref<1x128xf32, #tpu.memory_space<vmem>>)
    %c0_i32_39 = arith.constant 0 : i32
    %c3_i32 = arith.constant 3 : i32
    %c0_i32_40 = arith.constant 0 : i32
    %c0_i32_41 = arith.constant 0 : i32
    %38 = tpu.memref_slice %arg3[%c0_i32_40, %c0_i32_41] : memref<16x128xf32, #tpu.memory_space<any>> -> memref<1x128xf32, #tpu.memory_space<any>>
    %c3_i32_42 = arith.constant 3 : i32
    %c0_i32_43 = arith.constant 0 : i32
    %39 = tpu.memref_slice %arg8[%3, %c3_i32_42, %c0_i32_43] : memref<2x8x128xf32, #tpu.memory_space<vmem>> -> memref<1x1x128xf32, #tpu.memory_space<vmem>>
    %40 = tpu.memref_squeeze %39 : memref<1x1x128xf32, #tpu.memory_space<vmem>> -> memref<1x128xf32, #tpu.memory_space<vmem>>
    %41 = tpu.memref_slice %arg10[%c0_i32_39, %3, %c3_i32] : memref<2x2x8x!tpu.dma_semaphore, #tpu.memory_space<semaphore_mem>> -> memref<1x1x1x!tpu.dma_semaphore, #tpu.memory_space<semaphore_mem>>
    %42 = tpu.memref_squeeze %41 : memref<1x1x1x!tpu.dma_semaphore, #tpu.memory_space<semaphore_mem>> -> memref<!tpu.dma_semaphore, #tpu.memory_space<semaphore_mem>>
    tpu.wait_dma2 semaphore(%42 : memref<!tpu.dma_semaphore, #tpu.memory_space<semaphore_mem>>) src(%38 : memref<1x128xf32, #tpu.memory_space<any>>) dst(%40 : memref<1x128xf32, #tpu.memory_space<vmem>>)
    %c1_i32_44 = arith.constant 1 : i32
    %c3_i32_45 = arith.constant 3 : i32
    %c0_i32_46 = arith.constant 0 : i32
    %c0_i32_47 = arith.constant 0 : i32
    %43 = tpu.memref_slice %arg4[%c0_i32_46, %c0_i32_47] : memref<16x128xf32, #tpu.memory_space<any>> -> memref<1x128xf32, #tpu.memory_space<any>>
    %c3_i32_48 = arith.constant 3 : i32
    %c0_i32_49 = arith.constant 0 : i32
    %44 = tpu.memref_slice %arg9[%3, %c3_i32_48, %c0_i32_49] : memref<2x8x128xf32, #tpu.memory_space<vmem>> -> memref<1x1x128xf32, #tpu.memory_space<vmem>>
    %45 = tpu.memref_squeeze %44 : memref<1x1x128xf32, #tpu.memory_space<vmem>> -> memref<1x128xf32, #tpu.memory_space<vmem>>
    %46 = tpu.memref_slice %arg10[%c1_i32_44, %3, %c3_i32_45] : memref<2x2x8x!tpu.dma_semaphore, #tpu.memory_space<semaphore_mem>> -> memref<1x1x1x!tpu.dma_semaphore, #tpu.memory_space<semaphore_mem>>
    %47 = tpu.memref_squeeze %46 : memref<1x1x1x!tpu.dma_semaphore, #tpu.memory_space<semaphore_mem>> -> memref<!tpu.dma_semaphore, #tpu.memory_space<semaphore_mem>>
    tpu.wait_dma2 semaphore(%47 : memref<!tpu.dma_semaphore, #tpu.memory_space<semaphore_mem>>) src(%43 : memref<1x128xf32, #tpu.memory_space<any>>) dst(%45 : memref<1x128xf32, #tpu.memory_space<vmem>>)
    %c0_i32_50 = arith.constant 0 : i32
    %c4_i32 = arith.constant 4 : i32
    %c0_i32_51 = arith.constant 0 : i32
    %c0_i32_52 = arith.constant 0 : i32
    %48 = tpu.memref_slice %arg3[%c0_i32_51, %c0_i32_52] : memref<16x128xf32, #tpu.memory_space<any>> -> memref<1x128xf32, #tpu.memory_space<any>>
    %c4_i32_53 = arith.constant 4 : i32
    %c0_i32_54 = arith.constant 0 : i32
    %49 = tpu.memref_slice %arg8[%3, %c4_i32_53, %c0_i32_54] : memref<2x8x128xf32, #tpu.memory_space<vmem>> -> memref<1x1x128xf32, #tpu.memory_space<vmem>>
    %50 = tpu.memref_squeeze %49 : memref<1x1x128xf32, #tpu.memory_space<vmem>> -> memref<1x128xf32, #tpu.memory_space<vmem>>
    %51 = tpu.memref_slice %arg10[%c0_i32_50, %3, %c4_i32] : memref<2x2x8x!tpu.dma_semaphore, #tpu.memory_space<semaphore_mem>> -> memref<1x1x1x!tpu.dma_semaphore, #tpu.memory_space<semaphore_mem>>
    %52 = tpu.memref_squeeze %51 : memref<1x1x1x!tpu.dma_semaphore, #tpu.memory_space<semaphore_mem>> -> memref<!tpu.dma_semaphore, #tpu.memory_space<semaphore_mem>>
    tpu.wait_dma2 semaphore(%52 : memref<!tpu.dma_semaphore, #tpu.memory_space<semaphore_mem>>) src(%48 : memref<1x128xf32, #tpu.memory_space<any>>) dst(%50 : memref<1x128xf32, #tpu.memory_space<vmem>>)
    %c1_i32_55 = arith.constant 1 : i32
    %c4_i32_56 = arith.constant 4 : i32
    %c0_i32_57 = arith.constant 0 : i32
    %c0_i32_58 = arith.constant 0 : i32
    %53 = tpu.memref_slice %arg4[%c0_i32_57, %c0_i32_58] : memref<16x128xf32, #tpu.memory_space<any>> -> memref<1x128xf32, #tpu.memory_space<any>>
    %c4_i32_59 = arith.constant 4 : i32
    %c0_i32_60 = arith.constant 0 : i32
    %54 = tpu.memref_slice %arg9[%3, %c4_i32_59, %c0_i32_60] : memref<2x8x128xf32, #tpu.memory_space<vmem>> -> memref<1x1x128xf32, #tpu.memory_space<vmem>>
    %55 = tpu.memref_squeeze %54 : memref<1x1x128xf32, #tpu.memory_space<vmem>> -> memref<1x128xf32, #tpu.memory_space<vmem>>
    %56 = tpu.memref_slice %arg10[%c1_i32_55, %3, %c4_i32_56] : memref<2x2x8x!tpu.dma_semaphore, #tpu.memory_space<semaphore_mem>> -> memref<1x1x1x!tpu.dma_semaphore, #tpu.memory_space<semaphore_mem>>
    %57 = tpu.memref_squeeze %56 : memref<1x1x1x!tpu.dma_semaphore, #tpu.memory_space<semaphore_mem>> -> memref<!tpu.dma_semaphore, #tpu.memory_space<semaphore_mem>>
    tpu.wait_dma2 semaphore(%57 : memref<!tpu.dma_semaphore, #tpu.memory_space<semaphore_mem>>) src(%53 : memref<1x128xf32, #tpu.memory_space<any>>) dst(%55 : memref<1x128xf32, #tpu.memory_space<vmem>>)
    %c0_i32_61 = arith.constant 0 : i32
    %c5_i32 = arith.constant 5 : i32
    %c0_i32_62 = arith.constant 0 : i32
    %c0_i32_63 = arith.constant 0 : i32
    %58 = tpu.memref_slice %arg3[%c0_i32_62, %c0_i32_63] : memref<16x128xf32, #tpu.memory_space<any>> -> memref<1x128xf32, #tpu.memory_space<any>>
    %c5_i32_64 = arith.constant 5 : i32
    %c0_i32_65 = arith.constant 0 : i32
    %59 = tpu.memref_slice %arg8[%3, %c5_i32_64, %c0_i32_65] : memref<2x8x128xf32, #tpu.memory_space<vmem>> -> memref<1x1x128xf32, #tpu.memory_space<vmem>>
    %60 = tpu.memref_squeeze %59 : memref<1x1x128xf32, #tpu.memory_space<vmem>> -> memref<1x128xf32, #tpu.memory_space<vmem>>
    %61 = tpu.memref_slice %arg10[%c0_i32_61, %3, %c5_i32] : memref<2x2x8x!tpu.dma_semaphore, #tpu.memory_space<semaphore_mem>> -> memref<1x1x1x!tpu.dma_semaphore, #tpu.memory_space<semaphore_mem>>
    %62 = tpu.memref_squeeze %61 : memref<1x1x1x!tpu.dma_semaphore, #tpu.memory_space<semaphore_mem>> -> memref<!tpu.dma_semaphore, #tpu.memory_space<semaphore_mem>>
    tpu.wait_dma2 semaphore(%62 : memref<!tpu.dma_semaphore, #tpu.memory_space<semaphore_mem>>) src(%58 : memref<1x128xf32, #tpu.memory_space<any>>) dst(%60 : memref<1x128xf32, #tpu.memory_space<vmem>>)
    %c1_i32_66 = arith.constant 1 : i32
    %c5_i32_67 = arith.constant 5 : i32
    %c0_i32_68 = arith.constant 0 : i32
    %c0_i32_69 = arith.constant 0 : i32
    %63 = tpu.memref_slice %arg4[%c0_i32_68, %c0_i32_69] : memref<16x128xf32, #tpu.memory_space<any>> -> memref<1x128xf32, #tpu.memory_space<any>>
    %c5_i32_70 = arith.constant 5 : i32
    %c0_i32_71 = arith.constant 0 : i32
    %64 = tpu.memref_slice %arg9[%3, %c5_i32_70, %c0_i32_71] : memref<2x8x128xf32, #tpu.memory_space<vmem>> -> memref<1x1x128xf32, #tpu.memory_space<vmem>>
    %65 = tpu.memref_squeeze %64 : memref<1x1x128xf32, #tpu.memory_space<vmem>> -> memref<1x128xf32, #tpu.memory_space<vmem>>
    %66 = tpu.memref_slice %arg10[%c1_i32_66, %3, %c5_i32_67] : memref<2x2x8x!tpu.dma_semaphore, #tpu.memory_space<semaphore_mem>> -> memref<1x1x1x!tpu.dma_semaphore, #tpu.memory_space<semaphore_mem>>
    %67 = tpu.memref_squeeze %66 : memref<1x1x1x!tpu.dma_semaphore, #tpu.memory_space<semaphore_mem>> -> memref<!tpu.dma_semaphore, #tpu.memory_space<semaphore_mem>>
    tpu.wait_dma2 semaphore(%67 : memref<!tpu.dma_semaphore, #tpu.memory_space<semaphore_mem>>) src(%63 : memref<1x128xf32, #tpu.memory_space<any>>) dst(%65 : memref<1x128xf32, #tpu.memory_space<vmem>>)
    %c0_i32_72 = arith.constant 0 : i32
    %c6_i32 = arith.constant 6 : i32
    %c0_i32_73 = arith.constant 0 : i32
    %c0_i32_74 = arith.constant 0 : i32
    %68 = tpu.memref_slice %arg3[%c0_i32_73, %c0_i32_74] : memref<16x128xf32, #tpu.memory_space<any>> -> memref<1x128xf32, #tpu.memory_space<any>>
    %c6_i32_75 = arith.constant 6 : i32
    %c0_i32_76 = arith.constant 0 : i32
    %69 = tpu.memref_slice %arg8[%3, %c6_i32_75, %c0_i32_76] : memref<2x8x128xf32, #tpu.memory_space<vmem>> -> memref<1x1x128xf32, #tpu.memory_space<vmem>>
    %70 = tpu.memref_squeeze %69 : memref<1x1x128xf32, #tpu.memory_space<vmem>> -> memref<1x128xf32, #tpu.memory_space<vmem>>
    %71 = tpu.memref_slice %arg10[%c0_i32_72, %3, %c6_i32] : memref<2x2x8x!tpu.dma_semaphore, #tpu.memory_space<semaphore_mem>> -> memref<1x1x1x!tpu.dma_semaphore, #tpu.memory_space<semaphore_mem>>
    %72 = tpu.memref_squeeze %71 : memref<1x1x1x!tpu.dma_semaphore, #tpu.memory_space<semaphore_mem>> -> memref<!tpu.dma_semaphore, #tpu.memory_space<semaphore_mem>>
    tpu.wait_dma2 semaphore(%72 : memref<!tpu.dma_semaphore, #tpu.memory_space<semaphore_mem>>) src(%68 : memref<1x128xf32, #tpu.memory_space<any>>) dst(%70 : memref<1x128xf32, #tpu.memory_space<vmem>>)
    %c1_i32_77 = arith.constant 1 : i32
    %c6_i32_78 = arith.constant 6 : i32
    %c0_i32_79 = arith.constant 0 : i32
    %c0_i32_80 = arith.constant 0 : i32
    %73 = tpu.memref_slice %arg4[%c0_i32_79, %c0_i32_80] : memref<16x128xf32, #tpu.memory_space<any>> -> memref<1x128xf32, #tpu.memory_space<any>>
    %c6_i32_81 = arith.constant 6 : i32
    %c0_i32_82 = arith.constant 0 : i32
    %74 = tpu.memref_slice %arg9[%3, %c6_i32_81, %c0_i32_82] : memref<2x8x128xf32, #tpu.memory_space<vmem>> -> memref<1x1x128xf32, #tpu.memory_space<vmem>>
    %75 = tpu.memref_squeeze %74 : memref<1x1x128xf32, #tpu.memory_space<vmem>> -> memref<1x128xf32, #tpu.memory_space<vmem>>
    %76 = tpu.memref_slice %arg10[%c1_i32_77, %3, %c6_i32_78] : memref<2x2x8x!tpu.dma_semaphore, #tpu.memory_space<semaphore_mem>> -> memref<1x1x1x!tpu.dma_semaphore, #tpu.memory_space<semaphore_mem>>
    %77 = tpu.memref_squeeze %76 : memref<1x1x1x!tpu.dma_semaphore, #tpu.memory_space<semaphore_mem>> -> memref<!tpu.dma_semaphore, #tpu.memory_space<semaphore_mem>>
    tpu.wait_dma2 semaphore(%77 : memref<!tpu.dma_semaphore, #tpu.memory_space<semaphore_mem>>) src(%73 : memref<1x128xf32, #tpu.memory_space<any>>) dst(%75 : memref<1x128xf32, #tpu.memory_space<vmem>>)
    %c0_i32_83 = arith.constant 0 : i32
    %c7_i32 = arith.constant 7 : i32
    %c0_i32_84 = arith.constant 0 : i32
    %c0_i32_85 = arith.constant 0 : i32
    %78 = tpu.memref_slice %arg3[%c0_i32_84, %c0_i32_85] : memref<16x128xf32, #tpu.memory_space<any>> -> memref<1x128xf32, #tpu.memory_space<any>>
    %c7_i32_86 = arith.constant 7 : i32
    %c0_i32_87 = arith.constant 0 : i32
    %79 = tpu.memref_slice %arg8[%3, %c7_i32_86, %c0_i32_87] : memref<2x8x128xf32, #tpu.memory_space<vmem>> -> memref<1x1x128xf32, #tpu.memory_space<vmem>>
    %80 = tpu.memref_squeeze %79 : memref<1x1x128xf32, #tpu.memory_space<vmem>> -> memref<1x128xf32, #tpu.memory_space<vmem>>
    %81 = tpu.memref_slice %arg10[%c0_i32_83, %3, %c7_i32] : memref<2x2x8x!tpu.dma_semaphore, #tpu.memory_space<semaphore_mem>> -> memref<1x1x1x!tpu.dma_semaphore, #tpu.memory_space<semaphore_mem>>
    %82 = tpu.memref_squeeze %81 : memref<1x1x1x!tpu.dma_semaphore, #tpu.memory_space<semaphore_mem>> -> memref<!tpu.dma_semaphore, #tpu.memory_space<semaphore_mem>>
    tpu.wait_dma2 semaphore(%82 : memref<!tpu.dma_semaphore, #tpu.memory_space<semaphore_mem>>) src(%78 : memref<1x128xf32, #tpu.memory_space<any>>) dst(%80 : memref<1x128xf32, #tpu.memory_space<vmem>>)
    %c1_i32_88 = arith.constant 1 : i32
    %c7_i32_89 = arith.constant 7 : i32
    %c0_i32_90 = arith.constant 0 : i32
    %c0_i32_91 = arith.constant 0 : i32
    %83 = tpu.memref_slice %arg4[%c0_i32_90, %c0_i32_91] : memref<16x128xf32, #tpu.memory_space<any>> -> memref<1x128xf32, #tpu.memory_space<any>>
    %c7_i32_92 = arith.constant 7 : i32
    %c0_i32_93 = arith.constant 0 : i32
    %84 = tpu.memref_slice %arg9[%3, %c7_i32_92, %c0_i32_93] : memref<2x8x128xf32, #tpu.memory_space<vmem>> -> memref<1x1x128xf32, #tpu.memory_space<vmem>>
    %85 = tpu.memref_squeeze %84 : memref<1x1x128xf32, #tpu.memory_space<vmem>> -> memref<1x128xf32, #tpu.memory_space<vmem>>
    %86 = tpu.memref_slice %arg10[%c1_i32_88, %3, %c7_i32_89] : memref<2x2x8x!tpu.dma_semaphore, #tpu.memory_space<semaphore_mem>> -> memref<1x1x1x!tpu.dma_semaphore, #tpu.memory_space<semaphore_mem>>
    %87 = tpu.memref_squeeze %86 : memref<1x1x1x!tpu.dma_semaphore, #tpu.memory_space<semaphore_mem>> -> memref<!tpu.dma_semaphore, #tpu.memory_space<semaphore_mem>>
    tpu.wait_dma2 semaphore(%87 : memref<!tpu.dma_semaphore, #tpu.memory_space<semaphore_mem>>) src(%83 : memref<1x128xf32, #tpu.memory_space<any>>) dst(%85 : memref<1x128xf32, #tpu.memory_space<vmem>>)
    %88 = arith.index_cast %3 : i32 to index
    %c0 = arith.constant 0 : index
    %c0_94 = arith.constant 0 : index
    %89 = vector.load %arg8[%88, %c0, %c0_94] : memref<2x8x128xf32, #tpu.memory_space<vmem>>, vector<1x8x128xf32>
    %90 = vector.shape_cast %89 : vector<1x8x128xf32> to vector<8x128xf32>
    %91 = arith.index_cast %3 : i32 to index
    %c0_95 = arith.constant 0 : index
    %c0_96 = arith.constant 0 : index
    %92 = vector.load %arg9[%91, %c0_95, %c0_96] : memref<2x8x128xf32, #tpu.memory_space<vmem>>, vector<1x8x128xf32>
    %93 = vector.shape_cast %92 : vector<1x8x128xf32> to vector<8x128xf32>
    %c0_97 = arith.constant 0 : index
    %c0_98 = arith.constant 0 : index
    %94 = vector.load %arg5[%c0_97, %c0_98] : memref<128x128xf32, #tpu.memory_space<vmem>>, vector<128x128xf32>
    %cst = arith.constant dense<0.000000e+00> : vector<8x128xf32>
    %95 = tpu.matmul %93, %94, %cst {dimension_numbers = #tpu.dot_dimension_numbers<[1], [0], [0], [1], [0, 0, 1, 1], [], []>} : vector<8x128xf32>, vector<128x128xf32>, vector<8x128xf32> -> vector<8x128xf32>
    %c0_99 = arith.constant 0 : index
    %c0_100 = arith.constant 0 : index
    %96 = vector.load %arg6[%c0_99, %c0_100] : memref<1x128xf32, #tpu.memory_space<vmem>>, vector<1x128xf32>
    %97 = vector.broadcast %96 : vector<1x128xf32> to vector<8x128xf32>
    %98 = arith.addf %95, %97 : vector<8x128xf32>
    %99 = arith.mulf %90, %98 : vector<8x128xf32>
    %cst_101 = arith.constant dense<0.000000e+00> : vector<8xf32>
    %100 = vector.multi_reduction <add>, %99, %cst_101 [1] : vector<8x128xf32> to vector<8xf32>
    %101 = vector.shape_cast %100 : vector<8xf32> to vector<8x1xf32>
    %cst_102 = arith.constant 0.000000e+00 : f32
    %102 = vector.broadcast %cst_102 : f32 to vector<8x1xf32>
    %103 = arith.subf %102, %101 : vector<8x1xf32>
    %cst_103 = arith.constant 0.000000e+00 : f32
    %104 = vector.broadcast %cst_103 : f32 to vector<8x1xf32>
    %105 = arith.maximumf %103, %104 : vector<8x1xf32>
    %106 = math.absf %101 : vector<8x1xf32>
    %cst_104 = arith.constant 0.000000e+00 : f32
    %107 = vector.broadcast %cst_104 : f32 to vector<8x1xf32>
    %108 = arith.subf %107, %106 : vector<8x1xf32>
    %109 = math.exp %108 : vector<8x1xf32>
    %110 = math.log1p %109 : vector<8x1xf32>
    %111 = arith.addf %105, %110 : vector<8x1xf32>
    %c8_i32 = arith.constant 8 : i32
    %112 = arith.muli %arg0, %c8_i32 : i32
    %113 = tpu.iota {dimensions = array<i32: 0>} : vector<8x1xi32>
    %114 = vector.broadcast %112 : i32 to vector<8x1xi32>
    %115 = arith.addi %114, %113 : vector<8x1xi32>
    %c8_i32_105 = arith.constant 8 : i32
    %116 = vector.broadcast %c8_i32_105 : i32 to vector<8x1xi32>
    %117 = arith.cmpi slt, %115, %116 : vector<8x1xi32>
    %118 = arith.extui %117 : vector<8x1xi1> to vector<8x1xi32>
    %119 = arith.sitofp %118 : vector<8x1xi32> to vector<8x1xf32>
    %c0_106 = arith.constant 0 : index
    %c0_107 = arith.constant 0 : index
    %120 = vector.load %arg11[%c0_106, %c0_107] : memref<1x1xf32, #tpu.memory_space<vmem>>, vector<1x1xf32>
    %121 = arith.mulf %111, %119 : vector<8x1xf32>
    %122 = vector.shape_cast %121 : vector<8x1xf32> to vector<1x8x1xf32>
    %cst_108 = arith.constant dense<0.000000e+00> : vector<1xf32>
    %123 = vector.multi_reduction <add>, %122, %cst_108 [1, 2] : vector<1x8x1xf32> to vector<1xf32>
    %124 = vector.shape_cast %123 : vector<1xf32> to vector<1x1x1xf32>
    %125 = vector.extract %124[0, 0, 0] : f32 from vector<1x1x1xf32>
    %126 = vector.broadcast %125 : f32 to vector<1x1xf32>
    %127 = arith.addf %120, %126 : vector<1x1xf32>
    %c0_109 = arith.constant 0 : index
    %c0_110 = arith.constant 0 : index
    %128 = vector.load %arg11[%c0_109, %c0_110] : memref<1x1xf32, #tpu.memory_space<vmem>>, vector<1x1xf32>
    tpu.vector_store %arg11[%c0_109, %c0_110], %127 {strides = array<i32>} : memref<1x1xf32, #tpu.memory_space<vmem>>, vector<1x1xf32>,
    %c0_i32_111 = arith.constant 0 : i32
    %129 = arith.cmpi eq, %arg0, %c0_i32_111 : i32
    %130 = arith.extui %129 : i1 to i32
    %c0_i32_112 = arith.constant 0 : i32
    %131 = arith.cmpi ne, %130, %c0_i32_112 : i32
    scf.if %131 {
      %c0_113 = arith.constant 0 : index
      %c0_114 = arith.constant 0 : index
      %132 = vector.load %arg11[%c0_113, %c0_114] : memref<1x1xf32, #tpu.memory_space<vmem>>, vector<1x1xf32>
      %cst_115 = arith.constant 1.250000e-01 : f32
      %133 = vector.broadcast %cst_115 : f32 to vector<1x1xf32>
      %134 = arith.mulf %132, %133 : vector<1x1xf32>
      %c0_116 = arith.constant 0 : index
      %c0_117 = arith.constant 0 : index
      %135 = vector.load %arg7[%c0_116, %c0_117] : memref<1x1xf32, #tpu.memory_space<vmem>>, vector<1x1xf32>
      tpu.vector_store %arg7[%c0_116, %c0_117], %134 {strides = array<i32>} : memref<1x1xf32, #tpu.memory_space<vmem>>, vector<1x1xf32>,
    } else {
    }
    return
  }
  func.func @transform_2(%arg0: i32, %arg1: memref<8xi32, #tpu.memory_space<smem>>, %arg2: memref<8xi32, #tpu.memory_space<smem>>) -> (i32, i32) {
    %c0_i32 = arith.constant 0 : i32
    %c0_i32_0 = arith.constant 0 : i32
    %c0_i32_1 = arith.constant 0 : i32
    return %c0_i32, %c0_i32_0 : i32, i32
  }
  func.func @transform_3(%arg0: i32, %arg1: memref<8xi32, #tpu.memory_space<smem>>, %arg2: memref<8xi32, #tpu.memory_space<smem>>) -> (i32, i32) {
    %c0_i32 = arith.constant 0 : i32
    %c0_i32_0 = arith.constant 0 : i32
    %c0_i32_1 = arith.constant 0 : i32
    return %c0_i32, %c0_i32_0 : i32, i32
  }
  func.func @transform_4(%arg0: i32, %arg1: memref<8xi32, #tpu.memory_space<smem>>, %arg2: memref<8xi32, #tpu.memory_space<smem>>) -> (i32, i32) {
    %c0_i32 = arith.constant 0 : i32
    %c0_i32_0 = arith.constant 0 : i32
    %c0_i32_1 = arith.constant 0 : i32
    return %c0_i32, %c0_i32_0 : i32, i32
  }
}

</mosaic_0001>

<bundles_post_ra>
// kernel: tpu_custom_call.1
= control target key start
LH: loop header
LB: loop body
LE: loop exit
PB: predicated region body
PF: predicated region fallthrough
CT: control target
= control target key end

     0   :  { %s1869_s21 = smov [#allocation7]   ;;  %s2211_s0 = inlined_call_operand.hbm [shape: s32[8], index: 0, kind: input, shape index: {}]   ;;  %s2212_s2 = inlined_call_operand.hbm [shape: f32[16,128], index: 2, kind: input, shape index: {}]   ;;  %s2213_s3 = inlined_call_operand.hbm [shape: f32[16,128], index: 3, kind: input, shape index: {}]   ;;  %s2214_s4 = inlined_call_operand.hbm [shape: f32[128,128], index: 4, kind: input, shape index: {}]   ;;  %s2215_s5 = inlined_call_operand.vmem [shape: f32[1,128], index: 5, kind: input, shape index: {}]   ;;  %s2216_s6 = inlined_call_operand.hbm [shape: f32[1,1], index: 6, kind: output, shape index: {}]   ;;  %s2217_s1 = inlined_call_operand.vmem [shape: s32[8], index: 1, kind: input, shape index: {}]  }
   0x1   :  { %12 = dma.hbm_to_smem %s2211_s0, 16, %s1869_s21, [#allocation6] }
   0x2   :  { %s13_s26 = sshll.u32 %s2217_s1, 4  ;;  %s14_s26 = int_to_ptr.vmem [resolvable:$true] %s13_s26 }
   0x3   :  { %s1427_s27 = scalar_lea.vmem %s14_s26, 16  ;;  %p1432_p1 = scmp.lt.s32.totalorder %s14_s26, %s14_s26 }
   0x4   :  { %p1428_p0 = scmp.ne.s32.totalorder %s14_s26, %s1427_s27  ;;  %p1433_p2 = scmp.lt.s32.totalorder %s1427_s27, %s1427_s27 }
   0x6   :  { %p1434_p3 = por %p1433_p2, %p1432_p1 }
   0x8   :  { %p1435_p4 = pnand %p1434_p3, %p1428_p0 }
   0xa   :  { %1438 = shalt.err (!%p1435_p4)  }
   0xb   :  { %s1870_s28 = smov [#allocation8]  }
   0xc   :  { %16 = dma.vmem_to_smem %s14_s26, 16, %s1870_s28, [#allocation6] }
   0xd   :  { %1831 = dma.done.wait [#allocation6], 32 }
   0xe   :  { %1832 = vsyncadd [#allocation6], 4294967264 }
   0xf   :  { %18 = sfence }
  0x10   :  { %19 = vsyncpa [#allocation10], 0 }
  0x11   :  { %20 = vsyncpa [#allocation11], 0  ;;  %s1871_s0 = smov [#allocation9]  }
  0x12   :  { %s26_s29 = sshll.u32 %s1871_s0, 4  ;;  %s27_s29 = int_to_ptr.vmem [resolvable:$true] %s26_s29 }
  0x13   :  { %s1447_s30 = scalar_lea.vmem %s27_s29, 2048  ;;  %p1452_p6 = scmp.lt.s32.totalorder %s27_s29, %s27_s29 }
  0x14   :  { %p1448_p5 = scmp.ne.s32.totalorder %s27_s29, %s1447_s30  ;;  %p1453_p7 = scmp.lt.s32.totalorder %s1447_s30, %s1447_s30 }
  0x16   :  { %p1454_p8 = por %p1453_p7, %p1452_p6 }
  0x18   :  { %p1455_p9 = pnand %p1454_p8, %p1448_p5 }
  0x1a   :  { %1458 = shalt.err (!%p1455_p9)
}
  0x1b   :  { %s1872_s1 = smov 128   ;;  %s1873_s7 = smov 8  }
  0x1c   :  { %32 = dma.hbm_to_vmem [thread:$0]  %s2214_s4, 2048, %s27_s29, [#allocation10], %s1872_s1, %s1872_s1, %s1873_s7  }
  0x1d   :  { %1833 = dma.done.wait [#allocation10], 2048  }
  0x1e   :  { %1834 = vsyncadd [#allocation10], 4294965248  ;;  %vm42_vm0 = vcmask 0   ;;  %s44_s10 = sld [smem:[#allocation7]]  ;;  %s1874_s11 = smov [#allocation2]   ;;  %v1875_v0 = vmov 0.0  }
  0x1f   :  { %s55_s12 = sshll.u32 %s1874_s11, 4  ;;  %43 = vst.msk [vmem:[#allocation5] sm:$0x1] %vm42_vm0, %v1875_v0  ;;  %s1941_s13 = sld [smem:[#allocation8]]  ;;  %s1939_s12 = int_to_ptr.vmem [resolvable:$true] %s55_s12 }
  0x20   :  { %s1876_s14 = smov [#allocation3]   ;;  %s1943_s16 = sld [smem:[#allocation7 + $0x1]] }
  0x21   :  { %s69_s15 = sshll.u32 %s1876_s14, 4  ;;  %s1877_s4 = smov [#allocation2 + $0x1]   ;;  %s1945_s15 = int_to_ptr.vmem [resolvable:$true] %s69_s15 }
  0x22   :  { %s86_s17 = sshll.u32 %s1877_s4, 4  ;;  %s1947_s18 = sld [smem:[#allocation8 + $0x1]]  ;;  %s1949_s17 = int_to_ptr.vmem [resolvable:$true] %s86_s17 }
  0x23   :  { %s1878_s20 = smov [#allocation3 + $0x1]   ;;  %s1960_s0 = scalar_lea.hbm %s2212_s2, 256 }
  0x24   :  { %s1242_s19 = sshll.u32 %s44_s10, 4  ;;  %s1951_s21 = sshll.u32 %s1878_s20, 4  ;;  %s102_s21 = int_to_ptr.vmem [resolvable:$true] %s1951_s21 }
  0x25   :  { %s47_s24 = scalar_lea.hbm %s2212_s2, %s1242_s19  ;;  %s1243_s25 = sshll.u32 %s1941_s13, 4 }
  0x26   :  { %s1459_s26 = scalar_lea.hbm %s47_s24, 16  ;;  %p1462_p11 = scmp.lt.s32.totalorder %s47_s24, %s2212_s2 }
  0x27   :  { %p1460_p10 = scmp.ne.s32.totalorder %s47_s24, %s1459_s26  ;;  %p1463_p12 = scmp.lt.s32.totalorder %s1960_s0, %s1459_s26 }
  0x29   :  { %p1464_p13 = por %p1463_p12, %p1462_p11 }
  0x2b   :  { %p1465_p0 = pnand %p1464_p13, %p1460_p10 }
  0x2d   :  { %1468 = shalt.err (!%p1465_p0)  }
  0x2e   :  { %s1469_s1 = scalar_lea.vmem %s1939_s12, 16  ;;  %s1969_s7 = scalar_lea.vmem %s1939_s12, 256 }
  0x2f   :  { %p1470_p1 = scmp.ne.s32.totalorder %s1939_s12, %s1469_s1  ;;  %p1474_p2 = scmp.lt.s32.totalorder %s1939_s12, %s1939_s12 }
  0x30   :  { %p1475_p3 = scmp.lt.s32.totalorder %s1969_s7, %s1469_s1 }
  0x32   :  { %p1476_p4 = por %p1475_p3, %p1474_p2 }
  0x34   :  { %p1477_p5 = pnand %p1476_p4, %p1470_p1 }
  0x36   :  { %1480 = shalt.err (!%p1477_p5)  }
  0x37   :  { %58 = dma.hbm_to_vmem [thread:$0]  %s47_s24, 16, %s1939_s12, [#allocation4] }
  0x38   :  { %s60_s10 = scalar_lea.hbm %s2213_s3, %s1243_s25  ;;  %s1246_s11 = sshll.u32 %s1943_s16, 4 }
  0x39   :  { %s1481_s13 = scalar_lea.hbm %s60_s10, 16  ;;  %s1982_s19 = scalar_lea.hbm %s2213_s3, 256 }
  0x3a   :  { %p1482_p6 = scmp.ne.s32.totalorder %s60_s10, %s1481_s13  ;;  %p1484_p7 = scmp.lt.s32.totalorder %s60_s10, %s2213_s3 }
  0x3b   :  { %p1485_p8 = scmp.lt.s32.totalorder %s1982_s19, %s1481_s13 }
  0x3d   :  { %p1486_p9 = por %p1485_p8, %p1484_p7 }
  0x3f   :  { %p1487_p10 = pnand %p1486_p9, %p1482_p6 }
  0x41   :  { %1490 = shalt.err (!%p1487_p10)  }
  0x42   :  { %s1491_s16 = scalar_lea.vmem %s1945_s15, 16  ;;  %s1991_s23 = scalar_lea.vmem %s1945_s15, 256 }
  0x43   :  { %p1492_p11 = scmp.ne.s32.totalorder %s1945_s15, %s1491_s16  ;;  %p1496_p12 = scmp.lt.s32.totalorder %s1945_s15, %s1945_s15 }
  0x44   :  { %p1497_p13 = scmp.lt.s32.totalorder %s1991_s23, %s1491_s16 }
  0x46   :  { %p1498_p0 = por %p1497_p13, %p1496_p12 }
  0x48   :  { %p1499_p1 = pnand %p1498_p0, %p1492_p11 }
  0x4a   :  { %1502 = shalt.err (!%p1499_p1)  }
  0x4b   :  { %72 = dma.hbm_to_vmem [thread:$0]  %s60_s10, 16, %s1945_s15, [#allocation4 + $0x10] }
  0x4c   :  { %s76_s26 = scalar_lea.hbm %s2212_s2, %s1246_s11  ;;  %s1247_s27 = sshll.u32 %s1947_s18, 4 }
  0x4d   :  { %s1503_s28 = scalar_lea.hbm %s76_s26, 16  ;;  %p1506_p3 = scmp.lt.s32.totalorder %s76_s26, %s2212_s2 }
  0x4e   :  { %p1504_p2 = scmp.ne.s32.totalorder %s76_s26, %s1503_s28  ;;  %p1507_p4 = scmp.lt.s32.totalorder %s1960_s0, %s1503_s28 }
  0x50   :  { %p1508_p5 = por %p1507_p4, %p1506_p3 }
  0x52   :  { %p1509_p6 = pnand %p1508_p5, %p1504_p2 }
  0x54   :  { %1512 = shalt.err (!%p1509_p6)  }
  0x55   :  { %s1513_s1 = scalar_lea.vmem %s1949_s17, 16  ;;  %p1518_p8 = scmp.lt.s32.totalorder %s1949_s17, %s1939_s12 }
  0x56   :  { %p1514_p7 = scmp.ne.s32.totalorder %s1949_s17, %s1513_s1  ;;  %p1519_p9 = scmp.lt.s32.totalorder %s1969_s7, %s1513_s1 }
  0x58   :  { %p1520_p10 = por %p1519_p9, %p1518_p8 }
  0x5a   :  { %p1521_p11 = pnand %p1520_p10, %p1514_p7 }
  0x5c   :  { %1524 = shalt.err (!%p1521_p11)  }
  0x5d   :  { %89 = dma.hbm_to_vmem [thread:$0]  %s76_s26, 16, %s1949_s17, [#allocation4 + $0x1] }
  0x5e   :  { %s91_s9 = scalar_lea.hbm %s2213_s3, %s1247_s27 }
  0x5f   :  { %s1525_s10 = scalar_lea.hbm %s91_s9, 16  ;;  %p1528_p13 = scmp.lt.s32.totalorder %s91_s9, %s2213_s3 }
  0x60   :  { %p1526_p12 = scmp.ne.s32.totalorder %s91_s9, %s1525_s10  ;;  %p1529_p0 = scmp.lt.s32.totalorder %s1982_s19, %s1525_s10 }
  0x62   :  { %p1530_p1 = por %p1529_p0, %p1528_p13 }
  0x64   :  { %p1531_p2 = pnand %p1530_p1, %p1526_p12 }
  0x66   :  { %1534 = shalt.err (!%p1531_p2)  }
  0x67   :  { %s1535_s14 = scalar_lea.vmem %s102_s21, 16  ;;  %p1540_p4 = scmp.lt.s32.totalorder %s102_s21, %s1945_s15 }
  0x68   :  { %p1536_p3 = scmp.ne.s32.totalorder %s102_s21, %s1535_s14  ;;  %p1541_p5 = scmp.lt.s32.totalorder %s1991_s23, %s1535_s14 }
  0x6a   :  { %p1542_p6 = por %p1541_p5, %p1540_p4 }
  0x6c   :  { %p1543_p7 = pnand %p1542_p6, %p1536_p3 }
  0x6e   :  { %1546 = shalt.err (!%p1543_p7)  }
  0x6f   :  { %104 = dma.hbm_to_vmem [thread:$0]  %s91_s9, 16, %s102_s21, [#allocation4 + $0x11] }
  0x70   :  { %s1248_s17 = sld [smem:[#allocation7 + $0x2]]  ;;  %s1879_s4 = smov [#allocation2 + $0x2]  }
  0x71   :  { %s118_s20 = sshll.u32 %s1879_s4, 4  ;;  %s2021_s22 = sld [smem:[#allocation8 + $0x2]]  ;;  %s119_s20 = int_to_ptr.vmem [resolvable:$true] %s118_s20 }
  0x72   :  { %s1880_s16 = smov [#allocation3 + $0x2]   ;;  %s2023_s25 = sld [smem:[#allocation7 + $0x3]] }
  0x73   :  { %s133_s24 = sshll.u32 %s1880_s16, 4  ;;  %s1881_s26 = smov [#allocation2 + $0x3]   ;;  %s2025_s24 = int_to_ptr.vmem [resolvable:$true] %s133_s24 }
  0x74   :  { %s150_s27 = sshll.u32 %s1881_s26, 4  ;;  %s2027_s28 = sld [smem:[#allocation8 + $0x3]]  ;;  %s2029_s27 = int_to_ptr.vmem [resolvable:$true] %s150_s27 }
  0x76   :  { %s1250_s29 = sshll.u32 %s1248_s17, 4 }
  0x77   :  { %s108_s1 = scalar_lea.hbm %s2212_s2, %s1250_s29  ;;  %s1251_s18 = sshll.u32 %s2021_s22, 4 }
  0x78   :  { %s1547_s8 = scalar_lea.hbm %s108_s1, 16  ;;  %p1550_p9 = scmp.lt.s32.totalorder %s108_s1, %s2212_s2 }
  0x79   :  { %p1548_p8 = scmp.ne.s32.totalorder %s108_s1, %s1547_s8  ;;  %p1551_p10 = scmp.lt.s32.totalorder %s1960_s0, %s1547_s8 }
  0x7b   :  { %p1552_p11 = por %p1551_p10, %p1550_p9 }
  0x7d   :  { %p1553_p12 = pnand %p1552_p11, %p1548_p8 }
  0x7f   :  { %1556 = shalt.err (!%p1553_p12)  }
  0x80   :  { %s1557_s11 = scalar_lea.vmem %s119_s20, 16  ;;  %p1562_p0 = scmp.lt.s32.totalorder %s119_s20, %s1939_s12 }
  0x81   :  { %p1558_p13 = scmp.ne.s32.totalorder %s119_s20, %s1557_s11  ;;  %p1563_p1 = scmp.lt.s32.totalorder %s1969_s7, %s1557_s11 }
  0x83   :  { %p1564_p2 = por %p1563_p1, %p1562_p0 }
  0x85   :  { %p1565_p3 = pnand %p1564_p2, %p1558_p13 }
  0x87   :  { %1568 = shalt.err (!%p1565_p3)  }
  0x88   :  { %121 = dma.hbm_to_vmem [thread:$0]  %s108_s1, 16, %s119_s20, [#allocation4 + $0x2] }
  0x89   :  { %s123_s17 = scalar_lea.hbm %s2213_s3, %s1251_s18  ;;  %s1254_s4 = sshll.u32 %s2023_s25, 4 }
  0x8a   :  { %s1569_s22 = scalar_lea.hbm %s123_s17, 16  ;;  %p1572_p5 = scmp.lt.s32.totalorder %s123_s17, %s2213_s3 }
  0x8b   :  { %p1570_p4 = scmp.ne.s32.totalorder %s123_s17, %s1569_s22  ;;  %p1573_p6 = scmp.lt.s32.totalorder %s1982_s19, %s1569_s22 }
  0x8d   :  { %p1574_p7 = por %p1573_p6, %p1572_p5 }
  0x8f   :  { %p1575_p8 = pnand %p1574_p7, %p1570_p4 }
  0x91   :  { %1578 = shalt.err (!%p1575_p8)  }
  0x92   :  { %s1579_s20 = scalar_lea.vmem %s2025_s24, 16  ;;  %p1584_p10 = scmp.lt.s32.totalorder %s2025_s24, %s1945_s15 }
  0x93   :  { %p1580_p9 = scmp.ne.s32.totalorder %s2025_s24, %s1579_s20  ;;  %p1585_p11 = scmp.lt.s32.totalorder %s1991_s23, %s1579_s20 }
  0x95   :  { %p1586_p12 = por %p1585_p11, %p1584_p10 }
  0x97   :  { %p1587_p13 = pnand %p1586_p12, %p1580_p9 }
  0x99   :  { %1590 = shalt.err (!%p1587_p13)  }
  0x9a   :  { %136 = dma.hbm_to_vmem [thread:$0]  %s123_s17, 16, %s2025_s24, [#allocation4 + $0x12] }
  0x9b   :  { %s140_s21 = scalar_lea.hbm %s2212_s2, %s1254_s4  ;;  %s1255_s30 = sshll.u32 %s2027_s28, 4 }
  0x9c   :  { %s1591_s1 = scalar_lea.hbm %s140_s21, 16  ;;  %p1594_p1 = scmp.lt.s32.totalorder %s140_s21, %s2212_s2 }
  0x9d   :  { %p1592_p0 = scmp.ne.s32.totalorder %s140_s21, %s1591_s1  ;;  %p1595_p2 = scmp.lt.s32.totalorder %s1960_s0, %s1591_s1 }
  0x9f   :  { %p1596_p3 = por %p1595_p2, %p1594_p1 }
  0xa1   :  { %p1597_p4 = pnand %p1596_p3, %p1592_p0 }
  0xa3   :  { %1600 = shalt.err (!%p1597_p4)  }
  0xa4   :  { %s1601_s24 = scalar_lea.vmem %s2029_s27, 16  ;;  %p1606_p6 = scmp.lt.s32.totalorder %s2029_s27, %s1939_s12 }
  0xa5   :  { %p1602_p5 = scmp.ne.s32.totalorder %s2029_s27, %s1601_s24  ;;  %p1607_p7 = scmp.lt.s32.totalorder %s1969_s7, %s1601_s24 }
  0xa7   :  { %p1608_p8 = por %p1607_p7, %p1606_p6 }
  0xa9   :  { %p1609_p9 = pnand %p1608_p8, %p1602_p5 }
  0xab   :  { %1612 = shalt.err (!%p1609_p9)  }
  0xac   :  { %153 = dma.hbm_to_vmem [thread:$0]  %s140_s21, 16, %s2029_s27, [#allocation4 + $0x3] }
  0xad   :  { %s155_s10 = scalar_lea.hbm %s2213_s3, %s1255_s30  ;;  %s1882_s11 = smov [#allocation3 + $0x3]  }
  0xae   :  { %s165_s13 = sshll.u32 %s1882_s11, 4  ;;  %s1256_s14 = sld [smem:[#allocation7 + $0x4]]  ;;  %s166_s13 = int_to_ptr.vmem [resolvable:$true] %s165_s13 }
  0xaf   :  { %s1613_s17 = scalar_lea.hbm %s155_s10, 16  ;;  %p1616_p11 = scmp.lt.s32.totalorder %s155_s10, %s2213_s3 }
  0xb0   :  { %p1614_p10 = scmp.ne.s32.totalorder %s155_s10, %s1613_s17  ;;  %p1617_p12 = scmp.lt.s32.totalorder %s1982_s19, %s1613_s17 }
  0xb2   :  { %p1618_p13 = por %p1617_p12, %p1616_p11 }
  0xb4   :  { %p1619_p0 = pnand %p1618_p13, %p1614_p10 }
  0xb6   :  { %1622 = shalt.err (!%p1619_p0)  }
  0xb7   :  { %s1623_s16 = scalar_lea.vmem %s166_s13, 16  ;;  %p1628_p2 = scmp.lt.s32.totalorder %s166_s13, %s1945_s15 }
  0xb8   :  { %p1624_p1 = scmp.ne.s32.totalorder %s166_s13, %s1623_s16  ;;  %p1629_p3 = scmp.lt.s32.totalorder %s1991_s23, %s1623_s16 }
  0xba   :  { %p1630_p4 = por %p1629_p3, %p1628_p2 }
  0xbc   :  { %p1631_p5 = pnand %p1630_p4, %p1624_p1 }
  0xbe   :  { %1634 = shalt.err (!%p1631_p5)  }
  0xbf   :  { %168 = dma.hbm_to_vmem [thread:$0]  %s155_s10, 16, %s166_s13, [#allocation4 + $0x13] }
  0xc0   :  { %s1883_s27 = smov [#allocation2 + $0x4]   ;;  %s1257_s20 = sld [smem:[#allocation8 + $0x4]] }
  0xc1   :  { %s182_s26 = sshll.u32 %s1883_s27, 4  ;;  %s1884_s25 = smov [#allocation3 + $0x4]   ;;  %s183_s26 = int_to_ptr.vmem [resolvable:$true] %s182_s26 }
  0xc2   :  { %s197_s29 = sshll.u32 %s1884_s25, 4  ;;  %s2078_s21 = sld [smem:[#allocation7 + $0x5]]  ;;  %s2080_s29 = int_to_ptr.vmem [resolvable:$true] %s197_s29 }
  0xc3   :  { %s1258_s30 = sshll.u32 %s1256_s14, 4 }
  0xc4   :  { %s172_s8 = scalar_lea.hbm %s2212_s2, %s1258_s30 }
  0xc5   :  { %s1635_s24 = scalar_lea.hbm %s172_s8, 16  ;;  %p1638_p7 = scmp.lt.s32.totalorder %s172_s8, %s2212_s2 }
  0xc6   :  { %p1636_p6 = scmp.ne.s32.totalorder %s172_s8, %s1635_s24  ;;  %p1639_p8 = scmp.lt.s32.totalorder %s1960_s0, %s1635_s24 }
  0xc8   :  { %p1640_p9 = por %p1639_p8, %p1638_p7 }
  0xca   :  { %p1641_p10 = pnand %p1640_p9, %p1636_p6 }
  0xcc   :  { %1644 = shalt.err (!%p1641_p10)  }
  0xcd   :  { %s1645_s10 = scalar_lea.vmem %s183_s26, 16  ;;  %p1650_p12 = scmp.lt.s32.totalorder %s183_s26, %s1939_s12 }
  0xce   :  { %p1646_p11 = scmp.ne.s32.totalorder %s183_s26, %s1645_s10  ;;  %p1651_p13 = scmp.lt.s32.totalorder %s1969_s7, %s1645_s10 }
  0xd0   :  { %p1652_p0 = por %p1651_p13, %p1650_p12 }
  0xd2   :  { %p1653_p1 = pnand %p1652_p0, %p1646_p11 }
  0xd4   :  { %1656 = shalt.err (!%p1653_p1)  }
  0xd5   :  { %185 = dma.hbm_to_vmem [thread:$0]  %s172_s8, 16, %s183_s26, [#allocation4 + $0x4] }
  0xd6   :  { %s1259_s11 = sshll.u32 %s1257_s20, 4  ;;  %s1885_s13 = smov [#allocation2 + $0x5]  }
  0xd7   :  { %s214_s14 = sshll.u32 %s1885_s13, 4  ;;  %s187_s22 = scalar_lea.hbm %s2213_s3, %s1259_s11  ;;  %s2094_s14 = int_to_ptr.vmem [resolvable:$true] %s214_s14 }
  0xd8   :  { %s1657_s16 = scalar_lea.hbm %s187_s22, 16  ;;  %p1660_p3 = scmp.lt.s32.totalorder %s187_s22, %s2213_s3 }
  0xd9   :  { %p1658_p2 = scmp.ne.s32.totalorder %s187_s22, %s1657_s16  ;;  %p1661_p4 = scmp.lt.s32.totalorder %s1982_s19, %s1657_s16 }
  0xdb   :  { %p1662_p5 = por %p1661_p4, %p1660_p3 }
  0xdd   :  { %p1663_p6 = pnand %p1662_p5, %p1658_p2 }
  0xdf   :  { %1666 = shalt.err (!%p1663_p6)  }
  0xe0   :  { %s1667_s26 = scalar_lea.vmem %s2080_s29, 16  ;;  %p1672_p8 = scmp.lt.s32.totalorder %s2080_s29, %s1945_s15 }
  0xe1   :  { %p1668_p7 = scmp.ne.s32.totalorder %s2080_s29, %s1667_s26  ;;  %p1673_p9 = scmp.lt.s32.totalorder %s1991_s23, %s1667_s26 }
  0xe3   :  { %p1674_p10 = por %p1673_p9, %p1672_p8 }
  0xe5   :  { %p1675_p11 = pnand %p1674_p10, %p1668_p7 }
  0xe7   :  { %1678 = shalt.err (!%p1675_p11)  }
  0xe8   :  { %200 = dma.hbm_to_vmem [thread:$0]  %s187_s22, 16, %s2080_s29, [#allocation4 + $0x14] }
  0xe9   :  { %s1262_s20 = sshll.u32 %s2078_s21, 4  ;;  %s1261_s30 = sld [smem:[#allocation8 + $0x5]] }
  0xea   :  { %s204_s8 = scalar_lea.hbm %s2212_s2, %s1262_s20 }
  0xeb   :  { %s1679_s24 = scalar_lea.hbm %s204_s8, 16  ;;  %p1682_p13 = scmp.lt.s32.totalorder %s204_s8, %s2212_s2 }
  0xec   :  { %p1680_p12 = scmp.ne.s32.totalorder %s204_s8, %s1679_s24  ;;  %p1683_p0 = scmp.lt.s32.totalorder %s1960_s0, %s1679_s24 }
  0xee   :  { %p1684_p1 = por %p1683_p0, %p1682_p13 }
  0xf0   :  { %p1685_p2 = pnand %p1684_p1, %p1680_p12 }
  0xf2   :  { %1688 = shalt.err (!%p1685_p2)  }
  0xf3   :  { %s1689_s29 = scalar_lea.vmem %s2094_s14, 16  ;;  %p1694_p4 = scmp.lt.s32.totalorder %s2094_s14, %s1939_s12 }
  0xf4   :  { %p1690_p3 = scmp.ne.s32.totalorder %s2094_s14, %s1689_s29  ;;  %p1695_p5 = scmp.lt.s32.totalorder %s1969_s7, %s1689_s29 }
  0xf6   :  { %p1696_p6 = por %p1695_p5, %p1694_p4 }
  0xf8   :  { %p1697_p7 = pnand %p1696_p6, %p1690_p3 }
  0xfa   :  { %1700 = shalt.err (!%p1697_p7)  }
  0xfb   :  { %217 = dma.hbm_to_vmem [thread:$0]  %s204_s8, 16, %s2094_s14, [#allocation4 + $0x5] }
  0xfc   :  { %s1886_s21 = smov [#allocation3 + $0x5]   ;;  %s1264_s11 = sld [smem:[#allocation7 + $0x6]] }
  0xfd   :  { %s229_s10 = sshll.u32 %s1886_s21, 4  ;;  %s1887_s13 = smov [#allocation2 + $0x6]   ;;  %s230_s10 = int_to_ptr.vmem [resolvable:$true] %s229_s10 }
  0xfe   :  { %s246_s17 = sshll.u32 %s1887_s13, 4  ;;  %s2120_s4 = sld [smem:[#allocation8 + $0x6]]  ;;  %s2122_s17 = int_to_ptr.vmem [resolvable:$true] %s246_s17 }
  0xff   :  { %s1263_s22 = sshll.u32 %s1261_s30, 4 }
 0x100   :  { %s219_s25 = scalar_lea.hbm %s2213_s3, %s1263_s22 }
 0x101   :  { %s1701_s26 = scalar_lea.hbm %s219_s25, 16  ;;  %p1704_p9 = scmp.lt.s32.totalorder %s219_s25, %s2213_s3 }
 0x102   :  { %p1702_p8 = scmp.ne.s32.totalorder %s219_s25, %s1701_s26  ;;  %p1705_p10 = scmp.lt.s32.totalorder %s1982_s19, %s1701_s26 }
 0x104   :  { %p1706_p11 = por %p1705_p10, %p1704_p9 }
 0x106   :  { %p1707_p12 = pnand %p1706_p11, %p1702_p8 }
 0x108   :  { %1710 = shalt.err (!%p1707_p12)  }
 0x109   :  { %s1711_s14 = scalar_lea.vmem %s230_s10, 16  ;;  %p1716_p0 = scmp.lt.s32.totalorder %s230_s10, %s1945_s15 }
 0x10a   :  { %p1712_p13 = scmp.ne.s32.totalorder %s230_s10, %s1711_s14  ;;  %p1717_p1 = scmp.lt.s32.totalorder %s1991_s23, %s1711_s14 }
 0x10c   :  { %p1718_p2 = por %p1717_p1, %p1716_p0 }
 0x10e   :  { %p1719_p3 = pnand %p1718_p2, %p1712_p13 }
 0x110   :  { %1722 = shalt.err (!%p1719_p3)  }
 0x111   :  { %232 = dma.hbm_to_vmem [thread:$0]  %s219_s25, 16, %s230_s10, [#allocation4 + $0x15] }
 0x112   :  { %s1266_s30 = sshll.u32 %s1264_s11, 4  ;;  %s1888_s18 = smov [#allocation3 + $0x6]  }
 0x113   :  { %s261_s8 = sshll.u32 %s1888_s18, 4  ;;  %s236_s9 = scalar_lea.hbm %s2212_s2, %s1266_s30  ;;  %s2136_s8 = int_to_ptr.vmem [resolvable:$true] %s261_s8 }
 0x114   :  { %s1723_s29 = scalar_lea.hbm %s236_s9, 16  ;;  %p1726_p5 = scmp.lt.s32.totalorder %s236_s9, %s2212_s2 }
 0x115   :  { %p1724_p4 = scmp.ne.s32.totalorder %s236_s9, %s1723_s29  ;;  %p1727_p6 = scmp.lt.s32.totalorder %s1960_s0, %s1723_s29 }
 0x117   :  { %p1728_p7 = por %p1727_p6, %p1726_p5 }
 0x119   :  { %p1729_p8 = pnand %p1728_p7, %p1724_p4 }
 0x11b   :  { %1732 = shalt.err (!%p1729_p8)  }
 0x11c   :  { %s1733_s10 = scalar_lea.vmem %s2122_s17, 16  ;;  %p1738_p10 = scmp.lt.s32.totalorder %s2122_s17, %s1939_s12 }
 0x11d   :  { %p1734_p9 = scmp.ne.s32.totalorder %s2122_s17, %s1733_s10  ;;  %p1739_p11 = scmp.lt.s32.totalorder %s1969_s7, %s1733_s10 }
 0x11f   :  { %p1740_p12 = por %p1739_p11, %p1738_p10 }
 0x121   :  { %p1741_p13 = pnand %p1740_p12, %p1734_p9 }
 0x123   :  { %1744 = shalt.err (!%p1741_p13)  }
 0x124   :  { %249 = dma.hbm_to_vmem [thread:$0]  %s236_s9, 16, %s2122_s17, [#allocation4 + $0x6] }
 0x125   :  { %s1267_s11 = sshll.u32 %s2120_s4, 4  ;;  %s1268_s22 = sld [smem:[#allocation7 + $0x7]] }
 0x126   :  { %s251_s25 = scalar_lea.hbm %s2213_s3, %s1267_s11 }
 0x127   :  { %s1745_s26 = scalar_lea.hbm %s251_s25, 16  ;;  %p1748_p1 = scmp.lt.s32.totalorder %s251_s25, %s2213_s3 }
 0x128   :  { %p1746_p0 = scmp.ne.s32.totalorder %s251_s25, %s1745_s26  ;;  %p1749_p2 = scmp.lt.s32.totalorder %s1982_s19, %s1745_s26 }
 0x12a   :  { %p1750_p3 = por %p1749_p2, %p1748_p1 }
 0x12c   :  { %p1751_p4 = pnand %p1750_p3, %p1746_p0 }
 0x12e   :  { %1754 = shalt.err (!%p1751_p4)  }
 0x12f   :  { %s1755_s17 = scalar_lea.vmem %s2136_s8, 16  ;;  %p1760_p6 = scmp.lt.s32.totalorder %s2136_s8, %s1945_s15 }
 0x130   :  { %p1756_p5 = scmp.ne.s32.totalorder %s2136_s8, %s1755_s17  ;;  %p1761_p7 = scmp.lt.s32.totalorder %s1991_s23, %s1755_s17 }
 0x132   :  { %p1762_p8 = por %p1761_p7, %p1760_p6 }
 0x134   :  { %p1763_p9 = pnand %p1762_p8, %p1756_p5 }
 0x136   :  { %1766 = shalt.err (!%p1763_p9)  }
 0x137   :  { %264 = dma.hbm_to_vmem [thread:$0]  %s251_s25, 16, %s2136_s8, [#allocation4 + $0x16] }
 0x138   :  { %s1889_s4 = smov [#allocation2 + $0x7]   ;;  %s1269_s30 = sld [smem:[#allocation8 + $0x7]] }
 0x139   :  { %s278_s14 = sshll.u32 %s1889_s4, 4  ;;  %s1890_s18 = smov [#allocation3 + $0x7]   ;;  %s279_s14 = int_to_ptr.vmem [resolvable:$true] %s278_s14 }
 0x13a   :  { %s293_s24 = sshll.u32 %s1890_s18, 4  ;;  %s1270_s28 = sshll.u32 %s1268_s22, 4  ;;  %s2165_s24 = int_to_ptr.vmem [resolvable:$true] %s293_s24 }
 0x13b   :  { %s268_s21 = scalar_lea.hbm %s2212_s2, %s1270_s28 }
 0x13c   :  { %s1767_s13 = scalar_lea.hbm %s268_s21, 16  ;;  %p1770_p11 = scmp.lt.s32.totalorder %s268_s21, %s2212_s2 }
 0x13d   :  { %p1768_p10 = scmp.ne.s32.totalorder %s268_s21, %s1767_s13  ;;  %p1771_p12 = scmp.lt.s32.totalorder %s1960_s0, %s1767_s13 }
 0x13f   :  { %p1772_p13 = por %p1771_p12, %p1770_p11 }
 0x141   :  { %p1773_p0 = pnand %p1772_p13, %p1768_p10 }
 0x143   :  { %1776 = shalt.err (!%p1773_p0)  }
 0x144   :  { %s1777_s8 = scalar_lea.vmem %s279_s14, 16  ;;  %p1782_p2 = scmp.lt.s32.totalorder %s279_s14, %s1939_s12 }
 0x145   :  { %p1778_p1 = scmp.ne.s32.totalorder %s279_s14, %s1777_s8  ;;  %p1783_p3 = scmp.lt.s32.totalorder %s1969_s7, %s1777_s8 }
 0x147   :  { %p1784_p4 = por %p1783_p3, %p1782_p2 }
 0x149   :  { %p1785_p5 = pnand %p1784_p4, %p1778_p1 }
 0x14b   :  { %1788 = shalt.err (!%p1785_p5)  }
 0x14c   :  { %281 = dma.hbm_to_vmem [thread:$0]  %s268_s21, 16, %s279_s14, [#allocation4 + $0x7] }
 0x14d   :  { %s1271_s22 = sshll.u32 %s1269_s30, 4 }
 0x14e   :  { %s283_s2 = scalar_lea.hbm %s2213_s3, %s1271_s22 }
 0x14f   :  { %s1789_s0 = scalar_lea.hbm %s283_s2, 16  ;;  %p1792_p7 = scmp.lt.s32.totalorder %s283_s2, %s2213_s3 }
 0x150   :  { %p1790_p6 = scmp.ne.s32.totalorder %s283_s2, %s1789_s0  ;;  %p1793_p8 = scmp.lt.s32.totalorder %s1982_s19, %s1789_s0 }
 0x152   :  { %p1794_p9 = por %p1793_p8, %p1792_p7 }
 0x154   :  { %p1795_p10 = pnand %p1794_p9, %p1790_p6 }
 0x156   :  { %1798 = shalt.err (!%p1795_p10)  }
 0x157   :  { %s1799_s12 = scalar_lea.vmem %s2165_s24, 16  ;;  %p1804_p12 = scmp.lt.s32.totalorder %s2165_s24, %s1945_s15 }
 0x158   :  { %p1800_p11 = scmp.ne.s32.totalorder %s2165_s24, %s1799_s12  ;;  %p1805_p13 = scmp.lt.s32.totalorder %s1991_s23, %s1799_s12 }
 0x15a   :  { %p1806_p0 = por %p1805_p13, %p1804_p12 }
 0x15c   :  { %p1807_p1 = pnand %p1806_p0, %p1800_p11 }
 0x15e   :  { %1810 = shalt.err (!%p1807_p1)  }
 0x15f   :  { %296 = dma.hbm_to_vmem [thread:$0]  %s283_s2, 16, %s2165_s24, [#allocation4 + $0x17] }
 0x160   :  { %1835 = dma.done.wait [#allocation4], 16 }
 0x161   :  { %1836 = vsyncadd [#allocation4], 4294967280 }
 0x162   :  { %1837 = dma.done.wait [#allocation4 + $0x10], 16 }
 0x163   :  { %1838 = vsyncadd [#allocation4 + $0x10], 4294967280 }
 0x164   :  { %1839 = dma.done.wait [#allocation4 + $0x1], 16 }
 0x165   :  { %1840 = vsyncadd [#allocation4 + $0x1], 4294967280 }
 0x166   :  { %1841 = dma.done.wait [#allocation4 + $0x11], 16 }
 0x167   :  { %1842 = vsyncadd [#allocation4 + $0x11], 4294967280 }
 0x168   :  { %1843 = dma.done.wait [#allocation4 + $0x2], 16 }
 0x169   :  { %1844 = vsyncadd [#allocation4 + $0x2], 4294967280 }
 0x16a   :  { %1845 = dma.done.wait [#allocation4 + $0x12], 16 }
 0x16b   :  { %1846 = vsyncadd [#allocation4 + $0x12], 4294967280 }
 0x16c   :  { %1847 = dma.done.wait [#allocation4 + $0x3], 16 }
 0x16d   :  { %1848 = vsyncadd [#allocation4 + $0x3], 4294967280 }
 0x16e   :  { %1849 = dma.done.wait [#allocation4 + $0x13], 16 }
 0x16f   :  { %1850 = vsyncadd [#allocation4 + $0x13], 4294967280 }
 0x170   :  { %1851 = dma.done.wait [#allocation4 + $0x4], 16 }
 0x171   :  { %1852 = vsyncadd [#allocation4 + $0x4], 4294967280 }
 0x172   :  { %1853 = dma.done.wait [#allocation4 + $0x14], 16 }
 0x173   :  { %1854 = vsyncadd [#allocation4 + $0x14], 4294967280 }
 0x174   :  { %1855 = dma.done.wait [#allocation4 + $0x5], 16 }
 0x175   :  { %1856 = vsyncadd [#allocation4 + $0x5], 4294967280 }
 0x176   :  { %1857 = dma.done.wait [#allocation4 + $0x15], 16 }
 0x177   :  { %1858 = vsyncadd [#allocation4 + $0x15], 4294967280 }
 0x178   :  { %1859 = dma.done.wait [#allocation4 + $0x6], 16 }
 0x179   :  { %1860 = vsyncadd [#allocation4 + $0x6], 4294967280 }
 0x17a   :  { %1861 = dma.done.wait [#allocation4 + $0x16], 16 }
 0x17b   :  { %1862 = vsyncadd [#allocation4 + $0x16], 4294967280 }
 0x17c   :  { %1863 = dma.done.wait [#allocation4 + $0x7], 16 }
 0x17d   :  { %1864 = vsyncadd [#allocation4 + $0x7], 4294967280 }
 0x17e   :  { %1865 = dma.done.wait [#allocation4 + $0x17], 16 }
 0x17f   :  { %1866 = vsyncadd [#allocation4 + $0x17], 4294967280  ;;  %1354 = vmatprep.subr.mxu0 %v1875_v0  ;;  %vm1891_vm1 = vmmov 0   ;;  %v668_v1 = vld [vmem:[#allocation9 + $0x78] sm:$0xff]  ;;  %v667_v2 = vld [vmem:[#allocation9 + $0x70] sm:$0xff]  ;;  %vm775_vm3 = vcmask 7168  }
 0x180   :  { %1386 = vmatprep.mubr.msk.f32.mxu0 %vm1891_vm1, %v1875_v0  ;;  %1355 = vmatpush3.msra.mxu0 %v668_v1  ;;  %v666_v3 = vld [vmem:[#allocation9 + $0x68] sm:$0xff]  ;;  %v665_v4 = vld [vmem:[#allocation9 + $0x60] sm:$0xff]  ;;  %v664_v5 = vld [vmem:[#allocation9 + $0x58] sm:$0xff]  ;;  %s1892_s7 = smov [#allocation12]  }
 0x181   :  { %1356 = vmatprep.subr.mxu0 %v1875_v0  ;;  %v663_v6 = vld [vmem:[#allocation9 + $0x50] sm:$0xff]  ;;  %v662_v7 = vld [vmem:[#allocation9 + $0x48] sm:$0xff]  ;;  %v661_v8 = vld [vmem:[#allocation9 + $0x40] sm:$0xff]  ;;  %s802_s19 = sshll.u32 %s1892_s7, 4  ;;  %s803_s19 = int_to_ptr.vmem [resolvable:$true] %s802_s19 }
 0x182   :  { %1357 = vmatpush3.msra.mxu0 %v667_v2  ;;  %v660_v9 = vld [vmem:[#allocation9 + $0x38] sm:$0xff]  ;;  %v659_v10 = vld [vmem:[#allocation9 + $0x30] sm:$0xff]  ;;  %v658_v11 = vld [vmem:[#allocation9 + $0x28] sm:$0xff]  ;;  %s1811_s23 = scalar_lea.vmem %s803_s19, 16  ;;  %s1815_s20 = scalar_lea.vmem %s803_s19, 32 }
 0x183   :  { %1358 = vmatprep.subr.mxu0 %v1875_v0  ;;  %v657_v12 = vld [vmem:[#allocation9 + $0x20] sm:$0xff]  ;;  %v656_v13 = vld [vmem:[#allocation9 + $0x18] sm:$0xff]  ;;  %v655_v14 = vld [vmem:[#allocation9 + $0x10] sm:$0xff]  ;;  %p1812_p2 = scmp.ne.s32.totalorder %s803_s19, %s1811_s23  ;;  %p1816_p3 = scmp.lt.s32.totalorder %s803_s19, %s803_s19 }
 0x184   :  { %1359 = vmatpush3.msra.mxu0 %v666_v3  ;;  %v654_v15 = vld [vmem:[#allocation9 + $0x8] sm:$0xff]  ;;  %v653_v16 = vld [vmem:[#allocation9] sm:$0xff]  ;;  %v1304_v18 = vld [vmem:[%s2215_s5] ss:$0 sm:$0xff]  ;;  %p1817_p4 = scmp.lt.s32.totalorder %s1815_s20, %s1811_s23 }
 0x185   :  { %1360 = vmatprep.subr.mxu0 %v1875_v0  ;;  %v652_v17 = vld [vmem:[#allocation3] sm:$0xff]  ;;  %v650_v20 = vld [vmem:[#allocation2] sm:$0xff] }
 0x186   :  { %1361 = vmatpush3.msra.mxu0 %v665_v4  ;;  %v773_v48 = vld [vmem:[#allocation5] sm:$0x1]  ;;  %p1818_p5 = por %p1817_p4, %p1816_p3 }
 0x187   :  { %1362 = vmatprep.subr.mxu0 %v1875_v0 }
 0x188   :  { %1363 = vmatpush3.msra.mxu0 %v664_v5  ;;  %p1819_p6 = pnand %p1818_p5, %p1812_p2 }
 0x189   :  { %1364 = vmatprep.subr.mxu0 %v1875_v0 }
 0x18a   :  { %1365 = vmatpush3.msra.mxu0 %v663_v6 }
 0x18b   :  { %1366 = vmatprep.subr.mxu0 %v1875_v0 }
 0x18c   :  { %1367 = vmatpush3.msra.mxu0 %v662_v7 }
 0x18d   :  { %1368 = vmatprep.subr.mxu0 %v1875_v0 }
 0x18e   :  { %1369 = vmatpush3.msra.mxu0 %v661_v8 }
 0x18f   :  { %1370 = vmatprep.subr.mxu0 %v1875_v0 }
 0x190   :  { %1371 = vmatpush3.msra.mxu0 %v660_v9 }
 0x191   :  { %1372 = vmatprep.subr.mxu0 %v1875_v0 }
 0x192   :  { %1373 = vmatpush3.msra.mxu0 %v659_v10 }
 0x193   :  { %1374 = vmatprep.subr.mxu0 %v1875_v0 }
 0x194   :  { %1375 = vmatpush3.msra.mxu0 %v658_v11 }
 0x195   :  { %1376 = vmatprep.subr.mxu0 %v1875_v0 }
 0x196   :  { %1377 = vmatpush3.msra.mxu0 %v657_v12 }
 0x197   :  { %1378 = vmatprep.subr.mxu0 %v1875_v0 }
 0x198   :  { %1379 = vmatpush3.msra.mxu0 %v656_v13 }
 0x199   :  { %1380 = vmatprep.subr.mxu0 %v1875_v0 }
 0x19a   :  { %1381 = vmatpush3.msra.mxu0 %v655_v14 }
 0x19b   :  { %1382 = vmatprep.subr.mxu0 %v1875_v0 }
 0x19c   :  { %1383 = vmatpush3.msra.mxu0 %v654_v15 }
 0x19d   :  { %1384 = vmatprep.subr.mxu0 %v1875_v0 }
 0x19e   :  { %1385 = vmatpush3.msra.mxu0 %v653_v16 }
 0x19f   :  { %1387 = vmatmul.mubr.f32.vlgmr.msra.gmra.mxu0 %v652_v17 }
 0x25f   :  { %v742_v19 = vpop.f32.mrf.mxu0 }
 0x260   :  { %v743_v21 = vadd.f32 %v1304_v18, %v742_v19 }
 0x261   :  { %v1388_v22 = vpop.f32.mrf.mxu0 }
 0x262   :  { %v746_v23 = vmul.f32 %v743_v21, %v650_v20 }
 0x264   :  { %747 = vadd.xlane.f32.xlu0 %v746_v23 }
 0x2ed   :  { %v748_v24 = vpop.xlane.xlu0 %747 }
 0x2ee   :  { %v751_v25 = vand.u32 2147483647, %v748_v24  ;;  %v749_v32 = vsub.f32 0.0, %v748_v24 }
 0x2f0   :  { %v752_v26 = vsub.f32 0.0, %v751_v25  ;;  %v750_v37 = vmax.f32 %v749_v32, 0.0 }
 0x2f2   :  { %v753_v27 = vmul.f32 1.442695, %v752_v26 }
 0x2f4   :  { %1415 = vpow2.f32 %v753_v27 }
 0x301   :  { %v1416_v28 = vpop.eup %1415 }
 0x302   :  { %v755_v29 = vadd.f32 1.0, %v1416_v28  ;;  %v758_v30 = vmul.f32 -0.5, %v1416_v28  ;;  %v761_v33 = vand.u32 2147483647, %v1416_v28 }
 0x304   :  { %1417 = vlog2.f32 %v755_v29  ;;  %v759_v31 = vadd.f32 1.0, %v758_v30  ;;  %vm762_vm2 = vcmp.lt.f32.partialorder %v761_v33, 0.0004427343 }
 0x306   :  { %v760_v36 = vmul.f32 %v1416_v28, %v759_v31 }
 0x311   :  { %v1418_v34 = vpop.eup %1417 }
 0x312   :  { %v757_v35 = vmul.f32 0.6931472, %v1418_v34 }
 0x314   :  { %v763_v38 = vsel %vm762_vm2, %v760_v36, %v757_v35 }
 0x315   :  { %v764_v39 = vadd.f32 %v763_v38, %v750_v37 }
 0x317   :  { %v776_v40 = vsel %vm775_vm3, %v764_v39, 0.0 }
 0x318   :  { %777 = vadd.xlane.f32.xlu0 %v776_v40 }
 0x3a1   :  { %v778_v41 = vpop.xlane.xlu0 %777 }
 0x3a2   :  { %v779_v42 = vrot.slane %v778_v41, 4 }
 0x3a4   :  { %v780_v43 = vadd.f32 %v779_v42, %v778_v41 }
 0x3a6   :  { %v781_v44 = vrot.slane %v780_v43, 2 }
 0x3a8   :  { %v782_v45 = vadd.f32 %v781_v44, %v780_v43 }
 0x3aa   :  { %v783_v46 = vrot.slane %v782_v45, 1 }
 0x3ac   :  { %v784_v47 = vadd.f32 %v783_v46, %v782_v45 }
 0x3ae   :  { %1389 = vpush %v784_v47 }
 0x3df   :  { %s1390_s5 = spop %1389 }
 0x3e0   :  { %v786_v49 = vstv %s1390_s5 }
 0x3e1   :  { %v787_v50 = vadd.f32 %v786_v49, %v773_v48 }
 0x3e3   :  { %789 = vst.msk [vmem:[#allocation5] sm:$0x1] %vm42_vm0, %v787_v50 }
 0x3ea   :  { %v793_v51 = vld [vmem:[#allocation5] sm:$0x1] }
 0x3eb   :  { %v794_v52 = vmul.f32 0.125, %v793_v51 }
 0x3ed   :  { %795 = vst.msk [vmem:[#allocation12] sm:$0x1] %vm42_vm0, %v794_v52 }
 0x3ee   :  { %1822 = shalt.err (!%p1819_p6)
}
 0x3ef   :  { %805 = dma.vmem_to_hbm [thread:$0]  %s803_s19, 16, %s2216_s6, [#allocation11]  }
 0x3f0   :  { %1867 = dma.done.wait [#allocation11], 16  }
 0x3f1   :  { %1868 = vsyncadd [#allocation11], 4294967280 }
 0x3f2   :  { %809 = vsyncpa [#allocation10], 1 }
 0x3f3   :  { %810 = vsyncpa [#allocation11], 1 }
 0x3f4   :  { %811 = vsyncmov [#allocation4] }
 0x3f7   :  { %s812_s4 = vpop.sfrf %811 }
 0x3f8   :  { %p1305_p7 = scmp.ne.s32.totalorder %s812_s4, 0 }
 0x3fa   :  { %816 = shalt.err (%p1305_p7)  }
 0x3fb   :  { %818 = vsyncmov [#allocation4 + $0x1] }
 0x3fe   :  { %s819_s14 = vpop.sfrf %818 }
 0x3ff   :  { %p1306_p8 = scmp.ne.s32.totalorder %s819_s14, 0 }
 0x401   :  { %823 = shalt.err (%p1306_p8)  }
 0x402   :  { %825 = vsyncmov [#allocation4 + $0x2] }
 0x405   :  { %s826_s30 = vpop.sfrf %825 }
 0x406   :  { %p1307_p9 = scmp.ne.s32.totalorder %s826_s30, 0 }
 0x408   :  { %830 = shalt.err (%p1307_p9)  }
 0x409   :  { %832 = vsyncmov [#allocation4 + $0x3] }
 0x40c   :  { %s833_s18 = vpop.sfrf %832 }
 0x40d   :  { %p1308_p10 = scmp.ne.s32.totalorder %s833_s18, 0 }
 0x40f   :  { %837 = shalt.err (%p1308_p10)  }
 0x410   :  { %839 = vsyncmov [#allocation4 + $0x4] }
 0x413   :  { %s840_s6 = vpop.sfrf %839 }
 0x414   :  { %p1309_p11 = scmp.ne.s32.totalorder %s840_s6, 0 }
 0x416   :  { %844 = shalt.err (%p1309_p11)  }
 0x417   :  { %846 = vsyncmov [#allocation4 + $0x5] }
 0x41a   :  { %s847_s24 = vpop.sfrf %846 }
 0x41b   :  { %p1310_p12 = scmp.ne.s32.totalorder %s847_s24, 0 }
 0x41d   :  { %851 = shalt.err (%p1310_p12)  }
 0x41e   :  { %853 = vsyncmov [#allocation4 + $0x6] }
 0x421   :  { %s854_s28 = vpop.sfrf %853 }
 0x422   :  { %p1311_p13 = scmp.ne.s32.totalorder %s854_s28, 0 }
 0x424   :  { %858 = shalt.err (%p1311_p13)  }
 0x425   :  { %860 = vsyncmov [#allocation4 + $0x7] }
 0x428   :  { %s861_s9 = vpop.sfrf %860 }
 0x429   :  { %p1312_p0 = scmp.ne.s32.totalorder %s861_s9, 0 }
 0x42b   :  { %865 = shalt.err (%p1312_p0)  }
 0x42c   :  { %867 = vsyncmov [#allocation4 + $0x8] }
 0x42f   :  { %s868_s29 = vpop.sfrf %867 }
 0x430   :  { %p1313_p1 = scmp.ne.s32.totalorder %s868_s29, 0 }
 0x432   :  { %872 = shalt.err (%p1313_p1)  }
 0x433   :  { %874 = vsyncmov [#allocation4 + $0x9] }
 0x436   :  { %s875_s21 = vpop.sfrf %874 }
 0x437   :  { %p1314_p2 = scmp.ne.s32.totalorder %s875_s21, 0 }
 0x439   :  { %879 = shalt.err (%p1314_p2)  }
 0x43a   :  { %881 = vsyncmov [#allocation4 + $0xa] }
 0x43d   :  { %s882_s13 = vpop.sfrf %881 }
 0x43e   :  { %p1315_p3 = scmp.ne.s32.totalorder %s882_s13, 0 }
 0x440   :  { %886 = shalt.err (%p1315_p3)  }
 0x441   :  { %888 = vsyncmov [#allocation4 + $0xb] }
 0x444   :  { %s889_s10 = vpop.sfrf %888 }
 0x445   :  { %p1316_p4 = scmp.ne.s32.totalorder %s889_s10, 0 }
 0x447   :  { %893 = shalt.err (%p1316_p4)  }
 0x448   :  { %895 = vsyncmov [#allocation4 + $0xc] }
 0x44b   :  { %s896_s11 = vpop.sfrf %895 }
 0x44c   :  { %p1317_p5 = scmp.ne.s32.totalorder %s896_s11, 0 }
 0x44e   :  { %900 = shalt.err (%p1317_p5)  }
 0x44f   :  { %902 = vsyncmov [#allocation4 + $0xd] }
 0x452   :  { %s903_s8 = vpop.sfrf %902 }
 0x453   :  { %p1318_p6 = scmp.ne.s32.totalorder %s903_s8, 0 }
 0x455   :  { %907 = shalt.err (%p1318_p6)  }
 0x456   :  { %909 = vsyncmov [#allocation4 + $0xe] }
 0x459   :  { %s910_s22 = vpop.sfrf %909 }
 0x45a   :  { %p1319_p7 = scmp.ne.s32.totalorder %s910_s22, 0 }
 0x45c   :  { %914 = shalt.err (%p1319_p7)  }
 0x45d   :  { %916 = vsyncmov [#allocation4 + $0xf] }
 0x460   :  { %s917_s16 = vpop.sfrf %916 }
 0x461   :  { %p1320_p8 = scmp.ne.s32.totalorder %s917_s16, 0 }
 0x463   :  { %921 = shalt.err (%p1320_p8)  }
 0x464   :  { %923 = vsyncmov [#allocation4 + $0x10] }
 0x467   :  { %s924_s27 = vpop.sfrf %923 }
 0x468   :  { %p1321_p9 = scmp.ne.s32.totalorder %s924_s27, 0 }
 0x46a   :  { %928 = shalt.err (%p1321_p9)  }
 0x46b   :  { %930 = vsyncmov [#allocation4 + $0x11] }
 0x46e   :  { %s931_s2 = vpop.sfrf %930 }
 0x46f   :  { %p1322_p10 = scmp.ne.s32.totalorder %s931_s2, 0 }
 0x471   :  { %935 = shalt.err (%p1322_p10)  }
 0x472   :  { %937 = vsyncmov [#allocation4 + $0x12] }
 0x475   :  { %s938_s0 = vpop.sfrf %937 }
 0x476   :  { %p1323_p11 = scmp.ne.s32.totalorder %s938_s0, 0 }
 0x478   :  { %942 = shalt.err (%p1323_p11)  }
 0x479   :  { %944 = vsyncmov [#allocation4 + $0x13] }
 0x47c   :  { %s945_s25 = vpop.sfrf %944 }
 0x47d   :  { %p1324_p12 = scmp.ne.s32.totalorder %s945_s25, 0 }
 0x47f   :  { %949 = shalt.err (%p1324_p12)  }
 0x480   :  { %951 = vsyncmov [#allocation4 + $0x14] }
 0x483   :  { %s952_s26 = vpop.sfrf %951 }
 0x484   :  { %p1325_p13 = scmp.ne.s32.totalorder %s952_s26, 0 }
 0x486   :  { %956 = shalt.err (%p1325_p13)  }
 0x487   :  { %958 = vsyncmov [#allocation4 + $0x15] }
 0x48a   :  { %s959_s12 = vpop.sfrf %958 }
 0x48b   :  { %p1326_p0 = scmp.ne.s32.totalorder %s959_s12, 0 }
 0x48d   :  { %963 = shalt.err (%p1326_p0)  }
 0x48e   :  { %965 = vsyncmov [#allocation4 + $0x16] }
 0x491   :  { %s966_s3 = vpop.sfrf %965 }
 0x492   :  { %p1327_p1 = scmp.ne.s32.totalorder %s966_s3, 0 }
 0x494   :  { %970 = shalt.err (%p1327_p1)  }
 0x495   :  { %972 = vsyncmov [#allocation4 + $0x17] }
 0x498   :  { %s973_s15 = vpop.sfrf %972 }
 0x499   :  { %p1328_p2 = scmp.ne.s32.totalorder %s973_s15, 0 }
 0x49b   :  { %977 = shalt.err (%p1328_p2)  }
 0x49c   :  { %979 = vsyncmov [#allocation4 + $0x18] }
 0x49f   :  { %s980_s5 = vpop.sfrf %979 }
 0x4a0   :  { %p1329_p3 = scmp.ne.s32.totalorder %s980_s5, 0 }
 0x4a2   :  { %984 = shalt.err (%p1329_p3)  }
 0x4a3   :  { %986 = vsyncmov [#allocation4 + $0x19] }
 0x4a6   :  { %s987_s7 = vpop.sfrf %986 }
 0x4a7   :  { %p1330_p4 = scmp.ne.s32.totalorder %s987_s7, 0 }
 0x4a9   :  { %991 = shalt.err (%p1330_p4)  }
 0x4aa   :  { %993 = vsyncmov [#allocation4 + $0x1a] }
 0x4ad   :  { %s994_s19 = vpop.sfrf %993 }
 0x4ae   :  { %p1331_p5 = scmp.ne.s32.totalorder %s994_s19, 0 }
 0x4b0   :  { %998 = shalt.err (%p1331_p5)  }
 0x4b1   :  { %1000 = vsyncmov [#allocation4 + $0x1b] }
 0x4b4   :  { %s1001_s23 = vpop.sfrf %1000 }
 0x4b5   :  { %p1332_p6 = scmp.ne.s32.totalorder %s1001_s23, 0 }
 0x4b7   :  { %1005 = shalt.err (%p1332_p6)  }
 0x4b8   :  { %1007 = vsyncmov [#allocation4 + $0x1c] }
 0x4bb   :  { %s1008_s20 = vpop.sfrf %1007 }
 0x4bc   :  { %p1333_p7 = scmp.ne.s32.totalorder %s1008_s20, 0 }
 0x4be   :  { %1012 = shalt.err (%p1333_p7)  }
 0x4bf   :  { %1014 = vsyncmov [#allocation4 + $0x1d] }
 0x4c2   :  { %s1015_s1 = vpop.sfrf %1014 }
 0x4c3   :  { %p1334_p8 = scmp.ne.s32.totalorder %s1015_s1, 0 }
 0x4c5   :  { %1019 = shalt.err (%p1334_p8)  }
 0x4c6   :  { %1021 = vsyncmov [#allocation4 + $0x1e] }
 0x4c9   :  { %s1022_s17 = vpop.sfrf %1021 }
 0x4ca   :  { %p1335_p9 = scmp.ne.s32.totalorder %s1022_s17, 0 }
 0x4cc   :  { %1026 = shalt.err (%p1335_p9)  }
 0x4cd   :  { %1028 = vsyncmov [#allocation4 + $0x1f] }
 0x4d0   :  { %s1029_s4 = vpop.sfrf %1028 }
 0x4d1   :  { %p1336_p10 = scmp.ne.s32.totalorder %s1029_s4, 0 }
 0x4d3   :  { %1033 = shalt.err (%p1336_p10)  }

</bundles_post_ra>
